<compile_context>
chip_gen: v7x
topology: tpu7x:2x2x1
jax: 0.10.0
libtpu: 0.0.40
codegen_flags: <defaults>
</compile_context>

<pallas_src>
import numpy as np
import jax
import jax.numpy as jnp
from jax import lax
from jax.experimental import pallas as pl
from jax.experimental.pallas import tpu as pltpu


# ----------------------------------------------------------------------------
# SANet.sample_2D equivalent (pure numpy, identical semantics to the PyTorch
# class-level meshgrid + fancy indexing).
# ----------------------------------------------------------------------------
def sample_2d(m, n):
    x = np.linspace(-0.3, 0.3, 46)
    y = np.linspace(-0.3, 0.3, 46)
    points = np.stack(np.meshgrid(x, y))                  # (2, 46, 46)
    ix = np.round(np.linspace(0, 45, m)).astype(int)
    iy = np.round(np.linspace(0, 45, n)).astype(int)
    gx, gy = np.meshgrid(ix, iy)
    p = points[:, gx.ravel(), gy.ravel()].T                # (m*n, 2)
    return jnp.asarray(p, dtype=jnp.float32)


# ----------------------------------------------------------------------------
# Small runtime/config helpers
# ----------------------------------------------------------------------------
_BUFFERED_ONE = None


def _buffered_one_supported():
    """Probe once whether pipeline_mode=pl.Buffered(1) compiles & runs."""
    global _BUFFERED_ONE
    if _BUFFERED_ONE is not None:
        return _BUFFERED_ONE

    def k(x_ref, o_ref):
        o_ref[...] = x_ref[...]

    try:
        f = pl.pallas_call(
            k,
            out_shape=jax.ShapeDtypeStruct((32, 128), jnp.float32),
            grid=(4,),
            in_specs=[pl.BlockSpec((8, 128), lambda i: (0, 0),
                                   pipeline_mode=pl.Buffered(1))],
            out_specs=pl.BlockSpec((8, 128), lambda i: (i, 0)),
        )
        r = jax.block_until_ready(f(jnp.ones((8, 128), jnp.float32)))
        _BUFFERED_ONE = bool(jnp.all(r == 1.0))
    except Exception:
        _BUFFERED_ONE = False
    return _BUFFERED_ONE


def _vmem_limit_bytes():
    """Per-generation scoped-VMEM limit: min(100 MiB, 3/4 of physical)."""
    try:
        cap = int(pltpu.get_tpu_info().vmem_capacity_bytes)
        return int(min(100 << 20, (cap * 3) // 4))
    except Exception:
        return None   # fall back to the compiler default


def _choose_q_tile(n_in, ratio, target=512):
    """Query-row tile: multiple of n_in (so the tile is whole repeats of p_in),
    divides M = n_in*ratio, and is <= target rows when possible."""
    m = n_in * ratio
    if m <= target:
        return m
    best = n_in
    for k in range(1, ratio + 1):
        t = n_in * k
        if ratio % k == 0 and t <= target:
            best = t
    return best


def _choose_row_tile(r, target=512):
    if r <= target:
        return r
    best = r
    for t in range(8, target + 1, 8):
        if r % t == 0:
            best = t
    return best


# ----------------------------------------------------------------------------
# Pallas kernels (factories capture static config)
# ----------------------------------------------------------------------------
def _make_up_kernel(n_in, ratio, c_in, c_up, dh_p, tq, num_mf_layers):
    """Fused FoldingBlock.up with query-row-tiled self-attention.

    Grid = (batch, q_tile).  At q==0 the per-batch projections (p_2d and the
    fused, zero-padded h|l|g) are computed once into VMEM scratch; every grid
    step then does one (tq, M) attention tile + residual + M_f chain.
    """
    reps_tile = tq // n_in

    def kernel(p_ref, pts_ref, wup_ref, wtop_ref, wbot_ref, bhlg_ref, *rest):
        o_ref = rest[-3]
        hlg_sc = rest[-2]       # (M, 2*dh_p + c_in + c_up) bf16
        p2d_sc = rest[-1]       # (M, c_up) f32
        mf = rest[:-3]

        q = pl.program_id(1)

        @pl.when(q == 0)
        def _():
            p_in = p_ref[...].astype(jnp.bfloat16)                   # (n_in, C)
            # Un-tiled matmuls (rows of p_t are identical across the ratio
            # copies), then replicate.
            base_up = jnp.dot(p_in, wup_ref[...],
                              preferred_element_type=jnp.float32)    # (n_in, Cup)
            base_hlg = jnp.dot(p_in, wtop_ref[...],
                               preferred_element_type=jnp.float32)   # (n_in, Dhlg)
            up_full = jnp.concatenate([base_up] * ratio, axis=0)     # (M, Cup)
            hlg_top = jnp.concatenate([base_hlg] * ratio, axis=0)    # (M, Dhlg)
            # upmlp1: relu(p_t @ Wup + pts @ Wup_pts + b)  (pts term precomputed)
            p2d = jnp.maximum(up_full + pts_ref[...], 0.0)           # (M, Cup) f32
            p2d_sc[...] = p2d
            # Fused h|l|g projection without materializing p_cat:
            #   hlg = p_t @ Wtop + p2d @ Wbot + b   (zero-padded dh cols -> 0)
            hlg = hlg_top + jnp.dot(p2d.astype(jnp.bfloat16), wbot_ref[...],
                                    preferred_element_type=jnp.float32)
            hlg = jnp.maximum(hlg + bhlg_ref[...], 0.0)
            hlg_sc[...] = hlg.astype(hlg_sc.dtype)                   # bf16

        # ---- one query-row tile of the self-attention ----
        row0 = pl.multiple_of(q * tq, tq)
        h_all = hlg_sc[:, :dh_p]                                     # (M, dh_p) bf16
        g_all = hlg_sc[:, 2 * dh_p:]                                 # (M, 2C)   bf16
        l_tile = hlg_sc[pl.ds(row0, tq), dh_p:2 * dh_p]              # (tq, dh_p)

        # scores = l @ h^T, contracting the dh axes (no explicit transpose;
        # zero-padded dh columns contribute nothing).
        s = lax.dot_general(l_tile, h_all,
                            dimension_numbers=(((1,), (1,)), ((), ())),
                            preferred_element_type=jnp.float32)      # (tq, M)
        s = s - jnp.max(s, axis=-1, keepdims=True)
        e = jnp.exp(s)
        denom = jnp.sum(e, axis=-1, keepdims=True)
        # Un-normalized attn @ g on the MXU, then scale rows (no (M,M) attn buf).
        applied = jnp.dot(e.astype(jnp.bfloat16), g_all,
                          preferred_element_type=jnp.float32)        # (tq, 2C)
        applied = applied * pl.reciprocal(denom, approx=True)

        # Residual added into the two lane halves; first M_f weight row-split
        # so p_cat is never materialized.
        p_t_tile = jnp.concatenate([p_ref[...]] * reps_tile, axis=0)  # (tq, C) f32
        p2d_tile = p2d_sc[pl.ds(row0, tq), :]                         # (tq, Cup)
        left = (applied[:, :c_in] + p_t_tile).astype(jnp.bfloat16)
        right = (applied[:, c_in:] + p2d_tile).astype(jnp.bfloat16)

        w1 = mf[0]
        b1 = mf[1]
        x = (jnp.dot(left, w1[:c_in, :], preferred_element_type=jnp.float32)
             + jnp.dot(right, w1[c_in:, :], preferred_element_type=jnp.float32)
             + b1[...])
        x = jnp.maximum(x, 0.0)
        for i in range(1, num_mf_layers):
            w = mf[2 * i][...]
            b = mf[2 * i + 1][...]
            x = jnp.maximum(
                jnp.dot(x.astype(jnp.bfloat16), w,
                        preferred_element_type=jnp.float32) + b, 0.0)
        o_ref[...] = x

    return kernel


def _make_mlp_kernel(num_layers):
    """Fused Linear+ReLU chain over a (rows, features) tile (used for M_down)."""

    def kernel(x_ref, *rest):
        o_ref = rest[-1]
        prefs = rest[:-1]
        x = x_ref[...]
        for i in range(num_layers):
            w = prefs[2 * i][...]
            b = prefs[2 * i + 1][...]
            x = jnp.maximum(
                jnp.dot(x.astype(jnp.bfloat16), w,
                        preferred_element_type=jnp.float32) + b, 0.0)
        o_ref[...] = x

    return kernel


# ----------------------------------------------------------------------------
# Deterministic parameter init (synthetic; mirrors nn.Linear shapes)
# ----------------------------------------------------------------------------
def init_linear(key, din, dout):
    kw, kb = jax.random.split(key)
    w = jax.random.normal(kw, (din, dout), jnp.float32) * (1.0 / np.sqrt(din))
    b = jax.random.normal(kb, (dout,), jnp.float32) * 0.01
    return w, b


def init_mlp(key, channels):
    keys = jax.random.split(key, len(channels) - 1)
    return [init_linear(keys[i - 1], channels[i - 1], channels[i])
            for i in range(1, len(channels))]


# ----------------------------------------------------------------------------
# FoldingBlock
# ----------------------------------------------------------------------------
class FoldingBlockPallas:
    def __init__(self, key, input_shape, output_shape, attn_channels, nn_up, nn_down):
        """attn_channels = [h_ch, l_ch, g_ch, f_ch] (channel lists, as in MLP())."""
        self.in_shape = input_shape
        self.out_shape = output_shape
        self.ratio = output_shape // input_shape
        h_ch, l_ch, g_ch, f_ch = attn_channels
        # In SANet, M_h / M_l / M_g and upmlp1 are always single Linear+ReLU layers.
        assert len(h_ch) == 2 and len(l_ch) == 2 and len(g_ch) == 2 and len(nn_up) == 2

        k = jax.random.split(key, 6)
        (wh, bh), = init_mlp(k[0], h_ch)
        (wl, bl), = init_mlp(k[1], l_ch)
        (wg, bg), = init_mlp(k[2], g_ch)
        mf = init_mlp(k[3], f_ch)
        (w_up, b_up), = init_mlp(k[4], nn_up)
        down = init_mlp(k[5], nn_down)

        # f32 copies for the pure-JAX reference check
        self.ref = dict(wh=wh, bh=bh, wl=wl, bl=bl, wg=wg, bg=bg,
                        mf=mf, w_up=w_up, b_up=b_up, down=down)

        # ---- static config / alignment checks ----
        self.c_in = nn_up[0] - 2            # C   (input feature channels)
        self.c_up = nn_up[1]                # Cup (upmlp1 output channels)
        c_cat = self.c_in + self.c_up       # p_cat width (2C in SANet)
        assert h_ch[0] == c_cat and l_ch[0] == c_cat and g_ch[0] == c_cat
        assert g_ch[1] == c_cat and f_ch[0] == c_cat
        assert self.c_in % 128 == 0 and self.c_up % 128 == 0, "lane-dense channels"
        assert input_shape % 8 == 0

        dh = h_ch[1]
        self.dh_p = ((dh + 127) // 128) * 128   # pad h/l width to a lane-dense 128x
        # TODO(synk): for production dh=64 the 128-pad ~doubles the h/l projection
        # width; drop the pad (unaligned lane slices) if that ever dominates.
        pad_w = ((0, 0), (0, self.dh_p - dh))
        pad_b = (0, self.dh_p - dh)
        # Fused [Wh_pad | Wl_pad | Wg], row-split at C so the kernel can do
        # hlg = p_t @ Wtop + p2d @ Wbot (no p_cat).
        w_hlg = jnp.concatenate([jnp.pad(wh, pad_w), jnp.pad(wl, pad_w), wg], axis=1)
        self.w_hlg_top = w_hlg[:self.c_in].astype(jnp.bfloat16)     # (C,   Dhlg)
        self.w_hlg_bot = w_hlg[self.c_in:].astype(jnp.bfloat16)     # (Cup, Dhlg)
        self.b_hlg = jnp.concatenate(
            [jnp.pad(bh, pad_b), jnp.pad(bl, pad_b), bg]).reshape(1, -1)  # f32

        # upmlp1 weight split: feature rows (bf16, MXU) vs. the 2 coordinate rows
        # (folded into a precomputed f32 "pts_term" together with the bias).
        self.w_up_p = w_up[:self.c_in].astype(jnp.bfloat16)         # (C, Cup)
        self.w_up_pts = w_up[self.c_in:]                             # (2, Cup) f32
        self.b_up = b_up.reshape(1, -1)                              # (1, Cup) f32

        self.mf_packed = [(w.astype(jnp.bfloat16), b.reshape(1, -1)) for w, b in mf]
        self.down_packed = [(w.astype(jnp.bfloat16), b.reshape(1, -1)) for w, b in down]

        self.q_tile = _choose_q_tile(input_shape, self.ratio)
        self._buffered_one = _buffered_one_supported()
        self._vmem_limit = _vmem_limit_bytes()

        self._up_kernel = _make_up_kernel(
            n_in=input_shape, ratio=self.ratio, c_in=self.c_in, c_up=self.c_up,
            dh_p=self.dh_p, tq=self.q_tile, num_mf_layers=len(self.mf_packed))
        self._down_kernel = _make_mlp_kernel(len(self.down_packed))
        # TODO(synk): self_attn2 / M_up2 are constructed in the PyTorch module but
        # never used by FoldingBlock.forward, so they are intentionally omitted.

    # -- BlockSpec for grid-invariant operands (single-buffered when supported) --
    def _const_spec(self, shape, grid_ndim):
        nd = len(shape)
        if grid_ndim == 1:
            idx = lambda i: (0,) * nd
        else:
            idx = lambda b, q: (0,) * nd
        if self._buffered_one:
            return pl.BlockSpec(shape, idx, pipeline_mode=pl.Buffered(1))
        return pl.BlockSpec(shape, idx)

    def _compiler_params(self, semantics):
        return pltpu.CompilerParams(dimension_semantics=semantics,
                                    vmem_limit_bytes=self._vmem_limit)

    # -- fused up path: one pallas_call, grid = (batch, q_tile) --
    def _up(self, p, pts_term):
        B, n_in, c = p.shape
        assert n_in == self.in_shape and c == self.c_in
        m_out = n_in * self.ratio
        tq = self.q_tile
        n_q = m_out // tq
        c_out = self.mf_packed[-1][0].shape[1]
        d_hlg = self.w_hlg_top.shape[1]

        in_specs = [
            pl.BlockSpec((None, n_in, c), lambda b, q: (b, 0, 0)),   # batch squeezed
            self._const_spec(pts_term.shape, 2),
            self._const_spec(self.w_up_p.shape, 2),
            self._const_spec(self.w_hlg_top.shape, 2),
            self._const_spec(self.w_hlg_bot.shape, 2),
            self._const_spec(self.b_hlg.shape, 2),
        ]
        flat = [pts_term, self.w_up_p, self.w_hlg_top, self.w_hlg_bot, self.b_hlg]
        for w, bias in self.mf_packed:
            in_specs.append(self._const_spec(w.shape, 2))
            in_specs.append(self._const_spec(bias.shape, 2))
            flat += [w, bias]

        return pl.pallas_call(
            self._up_kernel,
            out_shape=jax.ShapeDtypeStruct((B, m_out, c_out), jnp.float32),
            grid=(B, n_q),
            in_specs=in_specs,
            out_specs=pl.BlockSpec((None, tq, c_out), lambda b, q: (b, q, 0)),
            scratch_shapes=[
                pltpu.VMEM((m_out, d_hlg), jnp.bfloat16),     # fused h|l|g
                pltpu.VMEM((m_out, self.c_up), jnp.float32),  # p_2d (residual)
            ],
            compiler_params=self._compiler_params(("parallel", "arbitrary")),
        )(p, *flat)

    # -- fused down path: batch folded into matmul rows, tiled over rows --
    def _down(self, p1):
        B, _, cf = p1.shape
        d0 = self.ratio * cf
        rows = B * self.in_shape
        x = p1.reshape(rows, d0)                     # torch .view(-1, in, r*C)
        tr = _choose_row_tile(rows)
        d_out = self.down_packed[-1][0].shape[1]

        in_specs = [pl.BlockSpec((tr, d0), lambda i: (i, 0))]
        flat = []
        for w, bias in self.down_packed:
            in_specs.append(self._const_spec(w.shape, 1))
            in_specs.append(self._const_spec(bias.shape, 1))
            flat += [w, bias]

        out = pl.pallas_call(
            self._down_kernel,
            out_shape=jax.ShapeDtypeStruct((rows, d_out), jnp.float32),
            grid=(rows // tr,),
            in_specs=in_specs,
            out_specs=pl.BlockSpec((tr, d_out), lambda i: (i, 0)),
            compiler_params=self._compiler_params(("parallel",)),
        )(x, *flat)
        return out.reshape(B, self.in_shape, d_out)

    def __call__(self, p, m, n):
        pts = sample_2d(m, n)                                  # (M, 2)
        pts_term = pts @ self.w_up_pts + self.b_up             # (M, Cup) f32, tiny
        p1 = self._up(p, pts_term)
        p2 = self._down(p1)
        p2b = self._up(p - p2, pts_term)
        return p1 + p2b


# ----------------------------------------------------------------------------
# Pure-JAX f32 reference (mirrors the PyTorch forward exactly)
# ----------------------------------------------------------------------------
def folding_block_reference(block, p, m, n):
    r = block.ref
    ratio = block.ratio
    relu = lambda x: jnp.maximum(x, 0.0)

    def mlp(params, x):
        for w, b in params:
            x = relu(x @ w + b)
        return x

    def up(pp):
        pt = jnp.tile(pp, (1, ratio, 1))
        pts = sample_2d(m, n)
        pts_b = jnp.broadcast_to(pts[None], (pt.shape[0],) + pts.shape)
        p2d = relu(jnp.concatenate([pt, pts_b], -1) @ r["w_up"] + r["b_up"])
        pc = jnp.concatenate([pt, p2d], -1)
        h = relu(pc @ r["wh"] + r["bh"])
        l = relu(pc @ r["wl"] + r["bl"])
        g = relu(pc @ r["wg"] + r["bg"])
        s = jnp.einsum("bmk,bnk->bmn", l, h)
        attn = jax.nn.softmax(s, axis=-1)
        return mlp(r["mf"], pc + jnp.einsum("bmn,bnc->bmc", attn, g))

    def down(x):
        B = x.shape[0]
        return mlp(r["down"], x.reshape(B, block.in_shape, ratio * x.shape[2]))

    p1 = up(p)
    p2 = down(p1)
    return p1 + up(p - p2)


# ----------------------------------------------------------------------------
# Driver
# ----------------------------------------------------------------------------
if __name__ == "__main__":
    key = jax.random.PRNGKey(0)
    k_init, k_p = jax.random.split(key)

    # Small but lane-aligned configuration (the real SANet blocks use C in
    # {512, 256, 128}; here: in=8 points -> out=32 points, C=128, m*n == out).
    B, in_shape, out_shape, C = 2, 8, 32, 128
    m, n = 4, 8
    ratio = out_shape // in_shape
    c2 = 2 * C

    block = FoldingBlockPallas(
        k_init, in_shape, out_shape,
        attn_channels=[[c2, 16], [c2, 16], [c2, c2], [c2, C]],
        nn_up=[C + 2, C],
        nn_down=[ratio * C, C],
    )

    p = jax.random.normal(k_p, (B, in_shape, C), jnp.float32)

    fwd = jax.jit(lambda x: block(x, m, n))
    out = jax.block_until_ready(fwd(p))

    assert out.shape == (B, out_shape, C), out.shape
    assert bool(jnp.all(jnp.isfinite(out)))

    # Loose tolerance: kernels run bf16 matmuls (f32 accumulation), bf16 exp@g,
    # and approx reciprocal in the softmax normalization.
    ref = folding_block_reference(block, p, m, n)
    rel = jnp.linalg.norm(out - ref) / (jnp.linalg.norm(ref) + 1e-8)
    assert float(rel) < 0.1, f"relative error too large: {float(rel)}"

    print("KERNEL_OK")
</pallas_src>

<mosaic_0001>
module attributes {stable_mosaic.version = 11 : i64} {
  func.func @k(%arg0: i32, %arg1: memref<8x128xf32, #tpu.memory_space<vmem>>, %arg2: memref<8x128xf32, #tpu.memory_space<vmem>>) attributes {dimension_semantics = [#tpu.dimension_semantics<arbitrary>], iteration_bounds = array<i64: 4>, scalar_prefetch = 0 : i64, scratch_operands = 0 : i64, tpu.core_type = #tpu.core_type<tc>, window_params = [{pipeline_mode = #tpu.pipeline_mode<synchronous>, transform_indices = @transform_0, window_bounds = array<i64: 8, 128>}, {transform_indices = @transform_1, window_bounds = array<i64: 8, 128>}]} {
    %c0 = arith.constant 0 : index
    %c0_0 = arith.constant 0 : index
    %0 = vector.load %arg1[%c0, %c0_0] : memref<8x128xf32, #tpu.memory_space<vmem>>, vector<8x128xf32>
    %c0_1 = arith.constant 0 : index
    %c0_2 = arith.constant 0 : index
    %1 = vector.load %arg2[%c0_1, %c0_2] : memref<8x128xf32, #tpu.memory_space<vmem>>, vector<8x128xf32>
    tpu.vector_store %arg2[%c0_1, %c0_2], %0 {strides = array<i32>} : memref<8x128xf32, #tpu.memory_space<vmem>>, vector<8x128xf32>,
    return
  }
  func.func @transform_0(%arg0: i32) -> (i32, i32) {
    %c0_i32 = arith.constant 0 : i32
    %c0_i32_0 = arith.constant 0 : i32
    %c0_i32_1 = arith.constant 0 : i32
    return %c0_i32, %c0_i32_0 : i32, i32
  }
  func.func @transform_1(%arg0: i32) -> (i32, i32) {
    %c0_i32 = arith.constant 0 : i32
    %c0_i32_0 = arith.constant 0 : i32
    return %arg0, %c0_i32 : i32, i32
  }
}

module attributes {stable_mosaic.version = 11 : i64} {
  func.func @kernel(%arg0: i32, %arg1: memref<16x512xf32, #tpu.memory_space<vmem>>, %arg2: memref<512x128xbf16, #tpu.memory_space<vmem>>, %arg3: memref<1x128xf32, #tpu.memory_space<vmem>>, %arg4: memref<16x128xf32, #tpu.memory_space<vmem>>) attributes {dimension_semantics = [#tpu.dimension_semantics<parallel>], iteration_bounds = array<i64: 1>, scalar_prefetch = 0 : i64, scratch_operands = 0 : i64, tpu.core_type = #tpu.core_type<tc>, window_params = [{transform_indices = @transform_0, window_bounds = array<i64: 16, 512>}, {pipeline_mode = #tpu.pipeline_mode<synchronous>, transform_indices = @transform_1, window_bounds = array<i64: 512, 128>}, {pipeline_mode = #tpu.pipeline_mode<synchronous>, transform_indices = @transform_2, window_bounds = array<i64: 1, 128>}, {transform_indices = @transform_3, window_bounds = array<i64: 16, 128>}]} {
    %c0 = arith.constant 0 : index
    %c0_0 = arith.constant 0 : index
    %0 = vector.load %arg1[%c0, %c0_0] : memref<16x512xf32, #tpu.memory_space<vmem>>, vector<16x512xf32>
    %c0_1 = arith.constant 0 : index
    %c0_2 = arith.constant 0 : index
    %1 = vector.load %arg2[%c0_1, %c0_2] : memref<512x128xbf16, #tpu.memory_space<vmem>>, vector<512x128xbf16>
    %c0_3 = arith.constant 0 : index
    %c0_4 = arith.constant 0 : index
    %2 = vector.load %arg3[%c0_3, %c0_4] : memref<1x128xf32, #tpu.memory_space<vmem>>, vector<1x128xf32>
    %3 = arith.truncf %0 : vector<16x512xf32> to vector<16x512xbf16>
    %cst = arith.constant dense<0.000000e+00> : vector<16x128xf32>
    %4 = tpu.matmul %3, %1, %cst {dimension_numbers = #tpu.dot_dimension_numbers<[1], [0], [0], [1], [0, 0, 1, 1], [], []>} : vector<16x512xbf16>, vector<512x128xbf16>, vector<16x128xf32> -> vector<16x128xf32>
    %5 = vector.broadcast %2 : vector<1x128xf32> to vector<16x128xf32>
    %6 = arith.addf %4, %5 : vector<16x128xf32>
    %cst_5 = arith.constant 0.000000e+00 : f32
    %7 = vector.broadcast %cst_5 : f32 to vector<16x128xf32>
    %8 = arith.maximumf %6, %7 : vector<16x128xf32>
    %c0_6 = arith.constant 0 : index
    %c0_7 = arith.constant 0 : index
    %9 = vector.load %arg4[%c0_6, %c0_7] : memref<16x128xf32, #tpu.memory_space<vmem>>, vector<16x128xf32>
    tpu.vector_store %arg4[%c0_6, %c0_7], %8 {strides = array<i32>} : memref<16x128xf32, #tpu.memory_space<vmem>>, vector<16x128xf32>,
    return
  }
  func.func @transform_0(%arg0: i32) -> (i32, i32) {
    %c0_i32 = arith.constant 0 : i32
    %c0_i32_0 = arith.constant 0 : i32
    return %arg0, %c0_i32 : i32, i32
  }
  func.func @transform_1(%arg0: i32) -> (i32, i32) {
    %c0_i32 = arith.constant 0 : i32
    %c0_i32_0 = arith.constant 0 : i32
    %c0_i32_1 = arith.constant 0 : i32
    return %c0_i32, %c0_i32_0 : i32, i32
  }
  func.func @transform_2(%arg0: i32) -> (i32, i32) {
    %c0_i32 = arith.constant 0 : i32
    %c0_i32_0 = arith.constant 0 : i32
    %c0_i32_1 = arith.constant 0 : i32
    return %c0_i32, %c0_i32_0 : i32, i32
  }
  func.func @transform_3(%arg0: i32) -> (i32, i32) {
    %c0_i32 = arith.constant 0 : i32
    %c0_i32_0 = arith.constant 0 : i32
    return %arg0, %c0_i32 : i32, i32
  }
}

module attributes {stable_mosaic.version = 11 : i64} {
  func.func @kernel(%arg0: i32, %arg1: i32, %arg2: memref<1x8x128xf32, #tpu.memory_space<vmem>>, %arg3: memref<32x128xf32, #tpu.memory_space<vmem>>, %arg4: memref<128x128xbf16, #tpu.memory_space<vmem>>, %arg5: memref<128x512xbf16, #tpu.memory_space<vmem>>, %arg6: memref<128x512xbf16, #tpu.memory_space<vmem>>, %arg7: memref<1x512xf32, #tpu.memory_space<vmem>>, %arg8: memref<256x128xbf16, #tpu.memory_space<vmem>>, %arg9: memref<1x128xf32, #tpu.memory_space<vmem>>, %arg10: memref<1x32x128xf32, #tpu.memory_space<vmem>>, %arg11: memref<32x512xbf16, #tpu.memory_space<vmem>>, %arg12: memref<32x128xf32, #tpu.memory_space<vmem>>) attributes {dimension_semantics = [#tpu.dimension_semantics<parallel>, #tpu.dimension_semantics<arbitrary>], iteration_bounds = array<i64: 2, 1>, scalar_prefetch = 0 : i64, scratch_operands = 2 : i64, tpu.core_type = #tpu.core_type<tc>, window_params = [{transform_indices = @transform_0, window_bounds = array<i64: 1, 8, 128>}, {pipeline_mode = #tpu.pipeline_mode<synchronous>, transform_indices = @transform_1, window_bounds = array<i64: 32, 128>}, {pipeline_mode = #tpu.pipeline_mode<synchronous>, transform_indices = @transform_2, window_bounds = array<i64: 128, 128>}, {pipeline_mode = #tpu.pipeline_mode<synchronous>, transform_indices = @transform_3, window_bounds = array<i64: 128, 512>}, {pipeline_mode = #tpu.pipeline_mode<synchronous>, transform_indices = @transform_4, window_bounds = array<i64: 128, 512>}, {pipeline_mode = #tpu.pipeline_mode<synchronous>, transform_indices = @transform_5, window_bounds = array<i64: 1, 512>}, {pipeline_mode = #tpu.pipeline_mode<synchronous>, transform_indices = @transform_6, window_bounds = array<i64: 256, 128>}, {pipeline_mode = #tpu.pipeline_mode<synchronous>, transform_indices = @transform_7, window_bounds = array<i64: 1, 128>}, {transform_indices = @transform_8, window_bounds = array<i64: 1, 32, 128>}]} {
    %c0_i32 = arith.constant 0 : i32
    %0 = arith.cmpi eq, %arg1, %c0_i32 : i32
    %1 = arith.extui %0 : i1 to i32
    %c0_i32_0 = arith.constant 0 : i32
    %2 = arith.cmpi ne, %1, %c0_i32_0 : i32
    scf.if %2 {
      %c0_22 = arith.constant 0 : index
      %c0_23 = arith.constant 0 : index
      %c0_24 = arith.constant 0 : index
      %46 = vector.load %arg2[%c0_22, %c0_23, %c0_24] : memref<1x8x128xf32, #tpu.memory_space<vmem>>, vector<1x8x128xf32>
      %47 = vector.shape_cast %46 : vector<1x8x128xf32> to vector<8x128xf32>
      %48 = arith.truncf %47 : vector<8x128xf32> to vector<8x128xbf16>
      %c0_25 = arith.constant 0 : index
      %c0_26 = arith.constant 0 : index
      %49 = vector.load %arg4[%c0_25, %c0_26] : memref<128x128xbf16, #tpu.memory_space<vmem>>, vector<128x128xbf16>
      %cst_27 = arith.constant dense<0.000000e+00> : vector<8x128xf32>
      %50 = tpu.matmul %48, %49, %cst_27 {dimension_numbers = #tpu.dot_dimension_numbers<[1], [0], [0], [1], [0, 0, 1, 1], [], []>} : vector<8x128xbf16>, vector<128x128xbf16>, vector<8x128xf32> -> vector<8x128xf32>
      %c0_28 = arith.constant 0 : index
      %c0_29 = arith.constant 0 : index
      %51 = vector.load %arg5[%c0_28, %c0_29] : memref<128x512xbf16, #tpu.memory_space<vmem>>, vector<128x512xbf16>
      %cst_30 = arith.constant dense<0.000000e+00> : vector<8x512xf32>
      %52 = tpu.matmul %48, %51, %cst_30 {dimension_numbers = #tpu.dot_dimension_numbers<[1], [0], [0], [1], [0, 0, 1, 1], [], []>} : vector<8x128xbf16>, vector<128x512xbf16>, vector<8x512xf32> -> vector<8x512xf32>
      %53 = tpu.concatenate %50, %50, %50, %50 in 0 : vector<8x128xf32>, vector<8x128xf32>, vector<8x128xf32>, vector<8x128xf32> -> vector<32x128xf32>
      %54 = tpu.concatenate %52, %52, %52, %52 in 0 : vector<8x512xf32>, vector<8x512xf32>, vector<8x512xf32>, vector<8x512xf32> -> vector<32x512xf32>
      %c0_31 = arith.constant 0 : index
      %c0_32 = arith.constant 0 : index
      %55 = vector.load %arg3[%c0_31, %c0_32] : memref<32x128xf32, #tpu.memory_space<vmem>>, vector<32x128xf32>
      %56 = arith.addf %53, %55 : vector<32x128xf32>
      %cst_33 = arith.constant 0.000000e+00 : f32
      %57 = vector.broadcast %cst_33 : f32 to vector<32x128xf32>
      %58 = arith.maximumf %56, %57 : vector<32x128xf32>
      %c0_34 = arith.constant 0 : index
      %c0_35 = arith.constant 0 : index
      %59 = vector.load %arg12[%c0_34, %c0_35] : memref<32x128xf32, #tpu.memory_space<vmem>>, vector<32x128xf32>
      tpu.vector_store %arg12[%c0_34, %c0_35], %58 {strides = array<i32>} : memref<32x128xf32, #tpu.memory_space<vmem>>, vector<32x128xf32>,
      %60 = arith.truncf %58 : vector<32x128xf32> to vector<32x128xbf16>
      %c0_36 = arith.constant 0 : index
      %c0_37 = arith.constant 0 : index
      %61 = vector.load %arg6[%c0_36, %c0_37] : memref<128x512xbf16, #tpu.memory_space<vmem>>, vector<128x512xbf16>
      %cst_38 = arith.constant dense<0.000000e+00> : vector<32x512xf32>
      %62 = tpu.matmul %60, %61, %cst_38 {dimension_numbers = #tpu.dot_dimension_numbers<[1], [0], [0], [1], [0, 0, 1, 1], [], []>} : vector<32x128xbf16>, vector<128x512xbf16>, vector<32x512xf32> -> vector<32x512xf32>
      %63 = arith.addf %54, %62 : vector<32x512xf32>
      %c0_39 = arith.constant 0 : index
      %c0_40 = arith.constant 0 : index
      %64 = vector.load %arg7[%c0_39, %c0_40] : memref<1x512xf32, #tpu.memory_space<vmem>>, vector<1x512xf32>
      %65 = vector.broadcast %64 : vector<1x512xf32> to vector<32x512xf32>
      %66 = arith.addf %63, %65 : vector<32x512xf32>
      %cst_41 = arith.constant 0.000000e+00 : f32
      %67 = vector.broadcast %cst_41 : f32 to vector<32x512xf32>
      %68 = arith.maximumf %66, %67 : vector<32x512xf32>
      %69 = arith.truncf %68 : vector<32x512xf32> to vector<32x512xbf16>
      %c0_42 = arith.constant 0 : index
      %c0_43 = arith.constant 0 : index
      %70 = vector.load %arg11[%c0_42, %c0_43] : memref<32x512xbf16, #tpu.memory_space<vmem>>, vector<32x512xbf16>
      tpu.vector_store %arg11[%c0_42, %c0_43], %69 {strides = array<i32>} : memref<32x512xbf16, #tpu.memory_space<vmem>>, vector<32x512xbf16>,
    } else {
    }
    %c32_i32 = arith.constant 32 : i32
    %3 = arith.muli %arg1, %c32_i32 : i32
    %4 = tpu.assume_multiple %3, 32 : i32
    %c0 = arith.constant 0 : index
    %c0_1 = arith.constant 0 : index
    %5 = vector.load %arg11[%c0, %c0_1] : memref<32x512xbf16, #tpu.memory_space<vmem>>, vector<32x128xbf16>
    %c0_2 = arith.constant 0 : index
    %c256 = arith.constant 256 : index
    %6 = vector.load %arg11[%c0_2, %c256] : memref<32x512xbf16, #tpu.memory_space<vmem>>, vector<32x256xbf16>
    %7 = arith.index_cast %4 : i32 to index
    %c128 = arith.constant 128 : index
    %8 = vector.load %arg11[%7, %c128] : memref<32x512xbf16, #tpu.memory_space<vmem>>, vector<32x128xbf16>
    %cst = arith.constant dense<0.000000e+00> : vector<32x32xf32>
    %9 = tpu.matmul %8, %5, %cst {dimension_numbers = #tpu.dot_dimension_numbers<[1], [1], [0], [0], [0, 0, 1, 0], [], []>} : vector<32x128xbf16>, vector<32x128xbf16>, vector<32x32xf32> -> vector<32x32xf32>
    %cst_3 = arith.constant dense<0xFF800000> : vector<32xf32>
    %10 = vector.multi_reduction <maximumf>, %9, %cst_3 [1] : vector<32x32xf32> to vector<32xf32>
    %11 = vector.shape_cast %10 : vector<32xf32> to vector<32x1xf32>
    %12 = vector.broadcast %11 : vector<32x1xf32> to vector<32x32xf32>
    %13 = arith.subf %9, %12 : vector<32x32xf32>
    %14 = math.exp %13 : vector<32x32xf32>
    %cst_4 = arith.constant dense<0.000000e+00> : vector<32xf32>
    %15 = vector.multi_reduction <add>, %14, %cst_4 [1] : vector<32x32xf32> to vector<32xf32>
    %16 = vector.shape_cast %15 : vector<32xf32> to vector<32x1xf32>
    %17 = arith.truncf %14 : vector<32x32xf32> to vector<32x32xbf16>
    %cst_5 = arith.constant dense<0.000000e+00> : vector<32x256xf32>
    %18 = tpu.matmul %17, %6, %cst_5 {dimension_numbers = #tpu.dot_dimension_numbers<[1], [0], [0], [1], [0, 0, 1, 1], [], []>} : vector<32x32xbf16>, vector<32x256xbf16>, vector<32x256xf32> -> vector<32x256xf32>
    %19 = tpu.reciprocal %16 {approx = true} : vector<32x1xf32> -> vector<32x1xf32>
    %20 = vector.broadcast %19 : vector<32x1xf32> to vector<32x256xf32>
    %21 = arith.mulf %18, %20 : vector<32x256xf32>
    %c0_6 = arith.constant 0 : index
    %c0_7 = arith.constant 0 : index
    %c0_8 = arith.constant 0 : index
    %22 = vector.load %arg2[%c0_6, %c0_7, %c0_8] : memref<1x8x128xf32, #tpu.memory_space<vmem>>, vector<1x8x128xf32>
    %23 = vector.shape_cast %22 : vector<1x8x128xf32> to vector<8x128xf32>
    %24 = tpu.concatenate %23, %23, %23, %23 in 0 : vector<8x128xf32>, vector<8x128xf32>, vector<8x128xf32>, vector<8x128xf32> -> vector<32x128xf32>
    %25 = arith.index_cast %4 : i32 to index
    %c0_9 = arith.constant 0 : index
    %26 = vector.load %arg12[%25, %c0_9] : memref<32x128xf32, #tpu.memory_space<vmem>>, vector<32x128xf32>
    %27 = vector.extract_strided_slice %21 {offsets = [0, 0], sizes = [32, 128], strides = [1, 1]} : vector<32x256xf32> to vector<32x128xf32>
    %28 = arith.addf %27, %24 : vector<32x128xf32>
    %29 = arith.truncf %28 : vector<32x128xf32> to vector<32x128xbf16>
    %30 = vector.extract_strided_slice %21 {offsets = [0, 128], sizes = [32, 128], strides = [1, 1]} : vector<32x256xf32> to vector<32x128xf32>
    %31 = arith.addf %30, %26 : vector<32x128xf32>
    %32 = arith.truncf %31 : vector<32x128xf32> to vector<32x128xbf16>
    %c0_10 = arith.constant 0 : index
    %c0_11 = arith.constant 0 : index
    %33 = vector.load %arg8[%c0_10, %c0_11] : memref<256x128xbf16, #tpu.memory_space<vmem>>, vector<128x128xbf16>
    %cst_12 = arith.constant dense<0.000000e+00> : vector<32x128xf32>
    %34 = tpu.matmul %29, %33, %cst_12 {dimension_numbers = #tpu.dot_dimension_numbers<[1], [0], [0], [1], [0, 0, 1, 1], [], []>} : vector<32x128xbf16>, vector<128x128xbf16>, vector<32x128xf32> -> vector<32x128xf32>
    %c128_13 = arith.constant 128 : index
    %c0_14 = arith.constant 0 : index
    %35 = vector.load %arg8[%c128_13, %c0_14] : memref<256x128xbf16, #tpu.memory_space<vmem>>, vector<128x128xbf16>
    %cst_15 = arith.constant dense<0.000000e+00> : vector<32x128xf32>
    %36 = tpu.matmul %32, %35, %cst_15 {dimension_numbers = #tpu.dot_dimension_numbers<[1], [0], [0], [1], [0, 0, 1, 1], [], []>} : vector<32x128xbf16>, vector<128x128xbf16>, vector<32x128xf32> -> vector<32x128xf32>
    %37 = arith.addf %34, %36 : vector<32x128xf32>
    %c0_16 = arith.constant 0 : index
    %c0_17 = arith.constant 0 : index
    %38 = vector.load %arg9[%c0_16, %c0_17] : memref<1x128xf32, #tpu.memory_space<vmem>>, vector<1x128xf32>
    %39 = vector.broadcast %38 : vector<1x128xf32> to vector<32x128xf32>
    %40 = arith.addf %37, %39 : vector<32x128xf32>
    %cst_18 = arith.constant 0.000000e+00 : f32
    %41 = vector.broadcast %cst_18 : f32 to vector<32x128xf32>
    %42 = arith.maximumf %40, %41 : vector<32x128xf32>
    %c0_19 = arith.constant 0 : index
    %c0_20 = arith.constant 0 : index
    %c0_21 = arith.constant 0 : index
    %43 = vector.load %arg10[%c0_19, %c0_20, %c0_21] : memref<1x32x128xf32, #tpu.memory_space<vmem>>, vector<1x32x128xf32>
    %44 = vector.shape_cast %43 : vector<1x32x128xf32> to vector<32x128xf32>
    %45 = vector.shape_cast %42 : vector<32x128xf32> to vector<1x32x128xf32>
    tpu.vector_store %arg10[%c0_19, %c0_20, %c0_21], %45 {strides = array<i32>} : memref<1x32x128xf32, #tpu.memory_space<vmem>>, vector<1x32x128xf32>,
    return
  }
  func.func @transform_0(%arg0: i32, %arg1: i32) -> (i32, i32, i32) {
    %c0_i32 = arith.constant 0 : i32
    %c0_i32_0 = arith.constant 0 : i32
    %c0_i32_1 = arith.constant 0 : i32
    return %arg0, %c0_i32, %c0_i32_0 : i32, i32, i32
  }
  func.func @transform_1(%arg0: i32, %arg1: i32) -> (i32, i32) {
    %c0_i32 = arith.constant 0 : i32
    %c0_i32_0 = arith.constant 0 : i32
    %c0_i32_1 = arith.constant 0 : i32
    return %c0_i32, %c0_i32_0 : i32, i32
  }
  func.func @transform_2(%arg0: i32, %arg1: i32) -> (i32, i32) {
    %c0_i32 = arith.constant 0 : i32
    %c0_i32_0 = arith.constant 0 : i32
    %c0_i32_1 = arith.constant 0 : i32
    return %c0_i32, %c0_i32_0 : i32, i32
  }
  func.func @transform_3(%arg0: i32, %arg1: i32) -> (i32, i32) {
    %c0_i32 = arith.constant 0 : i32
    %c0_i32_0 = arith.constant 0 : i32
    %c0_i32_1 = arith.constant 0 : i32
    return %c0_i32, %c0_i32_0 : i32, i32
  }
  func.func @transform_4(%arg0: i32, %arg1: i32) -> (i32, i32) {
    %c0_i32 = arith.constant 0 : i32
    %c0_i32_0 = arith.constant 0 : i32
    %c0_i32_1 = arith.constant 0 : i32
    return %c0_i32, %c0_i32_0 : i32, i32
  }
  func.func @transform_5(%arg0: i32, %arg1: i32) -> (i32, i32) {
    %c0_i32 = arith.constant 0 : i32
    %c0_i32_0 = arith.constant 0 : i32
    %c0_i32_1 = arith.constant 0 : i32
    return %c0_i32, %c0_i32_0 : i32, i32
  }
  func.func @transform_6(%arg0: i32, %arg1: i32) -> (i32, i32) {
    %c0_i32 = arith.constant 0 : i32
    %c0_i32_0 = arith.constant 0 : i32
    %c0_i32_1 = arith.constant 0 : i32
    return %c0_i32, %c0_i32_0 : i32, i32
  }
  func.func @transform_7(%arg0: i32, %arg1: i32) -> (i32, i32) {
    %c0_i32 = arith.constant 0 : i32
    %c0_i32_0 = arith.constant 0 : i32
    %c0_i32_1 = arith.constant 0 : i32
    return %c0_i32, %c0_i32_0 : i32, i32
  }
  func.func @transform_8(%arg0: i32, %arg1: i32) -> (i32, i32, i32) {
    %c0_i32 = arith.constant 0 : i32
    %c0_i32_0 = arith.constant 0 : i32
    return %arg0, %arg1, %c0_i32 : i32, i32, i32
  }
}

</mosaic_0001>

<bundles_post_ra>
// kernel: tpu_custom_call.1
= control target key start
LH: loop header
LB: loop body
LE: loop exit
PB: predicated region body
PF: predicated region fallthrough
CT: control target
= control target key end

     0   :  { %6 = vsyncpa [#allocation3], 0  ;;  %s481_s0 = inlined_call_operand.hbm [shape: f32[8,128], index: 0, kind: input, shape index: {}]   ;;  %s482_s1 = inlined_call_operand.hbm [shape: f32[32,128], index: 1, kind: output, shape index: {}]  }
   0x1   :  { %7 = vsyncpa [#allocation4], 0 }
   0x2   :  { %9 = vsyncpa [#allocation4 + $0x1], 0  ;;  %s351_s6 = smov 0   ;;  %s353_s7 = smov 0  }
   0x3   :  { %s355_s8 = smov 0   ;;  %s357_s9 = smov 0  }
   0x4 LB: > { %s372_s10 = sadd.s32 4294967295, %s337_s9   ;;  %s183_s11 = sadd.s32 4294967294, %s337_s9   ;;  %s337_s9 = sphi %s357_s9, %s498_s9   ;;  %s333_s8 = sphi %s355_s8, %s497_s8   ;;  %s329_s7 = sphi %s353_s7, %s496_s7   ;;  %s325_s6 = sphi %s351_s6, %s495_s6  }
   0x5   : > { %s376_s12 = sadd.s32 1, %s337_s9   ;;  %s43_s13 = sadd.s32 1, %s333_s8 }
   0x6   : > { %s40_s14 = ssub.s32 %s337_s9, %s376_s12  ;;  %p53_p0 = scmp.ne.s32.totalorder %s333_s8, %s329_s7 }
   0x7   : > { %p41_p1 = scmp.eq.s32.totalorder %s40_s14, 0  ;;  %p54_p2 = scmp.eq.s32.totalorder %s372_s10, 3 }
   0x8   : > { %p59_p3 = scmp.ne.s32.totalorder %s329_s7, %s325_s6  ;;  %p60_p4 = scmp.eq.s32.totalorder %s183_s11, 3 }
   0x9   : > { %s387_s15 = scalar_select %p41_p1, %s333_s8, %s43_s13  }
   0xa   : > { %p389_p5 = por %p54_p2, %p53_p0  ;;  %p393_p6 = por %p60_p4, %p59_p3 }
   0xb   : > { %p184_p7 = scmp.ge.s32.totalorder %s337_s9, 1  ;;  %p67_p8 = scmp.lt.s32.totalorder %s337_s9, 5 }
   0xc   : > { %s486_s16 = scalar_select %p389_p5, 1, 0 }
   0xd   : > { %s487_s17 = scalar_select %p393_p6, 1, 0 }
   0xe   : > { %p483_p9 = scmp.eq.s32.totalorder %s372_s10, 0  ;;  %p400_p10 = pnand %p184_p7, %p67_p8 }
   0xf   : > { %s339_s19 = smov [#allocation2]   ;;  %s243_s24 = scalar_lea.hbm %s481_s0, 128 }
  0x10   : > { %s488_s18 = scalar_select %p400_p10, 1, 0 }
  0x11   : > { %s80_s20 = sshll.u32 %s339_s19, 4  ;;  %p199_p11 = pneg %p400_p10  ;;  %s81_s20 = int_to_ptr.vmem [resolvable:$true] %s80_s20 }
  0x12   : > { %p244_p13 = scmp.ne.s32.totalorder %s481_s0, %s243_s24  ;;  %p250_p3 = scmp.lt.u32.totalorder %s243_s24, %s481_s0 }
  0x13   : > { %p408_p12 = pnand %p483_p9, %p199_p11 }
  0x15   : > { %p245_p0 = pneg %p408_p12 }
  0x17   : > { %p246_p1 = pnand %p245_p0, %p244_p13 }
  0x19   : > { %p247_p2 = pneg %p246_p1 }
  0x1b   : > { %p252_p4 = pnand %p250_p3, %p247_p2 }
  0x1d   : > { %255 = shalt.err (!%p252_p4)
}
  0x1e   : > { %s256_s29 = scalar_lea.vmem %s81_s20, 128  ;;  %p264_p9 = scmp.lt.s32.totalorder %s81_s20, %s81_s20 }
  0x1f   : > { %p257_p7 = scmp.ne.s32.totalorder %s81_s20, %s256_s29  ;;  %p265_p6 = scmp.lt.s32.totalorder %s256_s29, %s256_s29 }
  0x21   : > { %p259_p8 = pnand %p257_p7, %p245_p0  ;;  %p266_p5 = por %p265_p6, %p264_p9 }
  0x23   : > { %p260_p11 = pneg %p259_p8 }
  0x25   : > { %p267_p10 = pnand %p266_p5, %p260_p11 }
  0x27   : > { %270 = shalt.err (!%p267_p10)
}
  0x28   : > { %202 = dma.hbm_to_vmem [thread:$0]  (!%p408_p12), %s481_s0, 128, %s81_s20, [#allocation3]  }
  0x29   : > { %p490_p13 = scmp.ne.s32.totalorder %s488_s18, 0 }
  0x2a   : > { %p491_p1 = scmp.eq.s32.totalorder (!%p490_p13), %s372_s10, 0 }
  0x2b   : > { %93 = sbr.rel (%p490_p13) target bundleno = 77 (0x4d), region = 24 }
  0x32   : > { %316 = dma.done.wait (%p491_p1), [#allocation3], 128   ;;  %p492_p0 = pmov %p491_p1 }
  0x33   : > { %s105_s3 = sand.u32 1, %s329_s7   ;;  %s190_s13 = sshll.u32 %s372_s10, 7  ;;  %v108_v0 = vld [vmem:[#allocation2] sm:$0xff] }
  0x34   : > { %318 = vsyncadd (%p492_p0), [#allocation3], 4294967168  ;;  %s188_s4 = sshll.u32 %s105_s3, 3  ;;  %s441_s18 = scalar_lea.hbm %s482_s1, %s190_s13 }
  0x35   : > { %s107_s5 = scalar_lea.vmem [#allocation5], %s188_s4  ;;  %s111_s20 = scalar_lea.sflag [#allocation4], %s105_s3 }
  0x36   : > { %s124_s11 = sshll.u32 %s107_s5, 4  ;;  %109 = vst [vmem:[%s107_s5] sm:$0xff] %v108_v0  ;;  %p493_p6 = scmp.ne.s32.totalorder %s486_s16, 0  ;;  %s436_s11 = int_to_ptr.vmem [resolvable:$true] %s124_s11 }
  0x37   : > { %s271_s21 = scalar_lea.vmem %s436_s11, 128  ;;  %s340_s22 = smov [#allocation5]  }
  0x38   : > { %p272_p5 = scmp.ne.s32.totalorder %s436_s11, %s271_s21  ;;  %s275_s10 = sshll.u32 %s340_s22, 4  ;;  %s276_s10 = int_to_ptr.vmem [resolvable:$false] %s275_s10 }
  0x39   : > { %s277_s23 = scalar_lea.vmem %s276_s10, 256  ;;  %p278_p12 = scmp.lt.s32.totalorder %s436_s11, %s276_s10 }
  0x3a   : > { %p273_p9 = pnand %p272_p5, %p493_p6  ;;  %p279_p2 = scmp.lt.s32.totalorder %s277_s23, %s271_s21 }
  0x3c   : > { %p274_p10 = pneg %p273_p9  ;;  %p280_p3 = por %p279_p2, %p278_p12 }
  0x3e   : > { %p281_p4 = pnand %p280_p3, %p274_p10 }
  0x40   : > { %284 = shalt.err (!%p281_p4)
}
  0x41   : > { %s285_s24 = scalar_lea.hbm %s441_s18, 128  ;;  %s289_s27 = scalar_lea.hbm %s482_s1, 512 }
  0x42   : > { %p286_p7 = scmp.ne.s32.totalorder %s441_s18, %s285_s24  ;;  %p290_p13 = scmp.lt.u32.totalorder %s441_s18, %s482_s1 }
  0x43   : > { %p291_p1 = scmp.lt.u32.totalorder %s289_s27, %s285_s24  ;;  %p293_p5 = scmp.lt.u32.totalorder %s285_s24, %s441_s18 }
  0x44   : > { %p287_p8 = pnand %p286_p7, %p493_p6 }
  0x45   : > { %p292_p0 = por %p291_p1, %p290_p13 }
  0x46   : > { %p288_p11 = pneg %p287_p8 }
  0x47   : > { %p294_p9 = por %p293_p5, %p292_p0 }
  0x49   : > { %p295_p10 = pnand %p294_p9, %p288_p11 }
  0x4b   : > { %298 = shalt.err (!%p295_p10)
}
  0x4c   : > { %197 = dma.vmem_to_hbm [thread:$0]  (%p493_p6), %s436_s11, 128, %s441_s18, %s111_s20  }
  0x4d PF: > { %p209_p12 = scmp.ge.s32.totalorder %s337_s9, 2  ;;  %s136_s30 = sand.u32 1, %s325_s6  }
  0x4e   : > { %p494_p2 = scmp.ne.s32.totalorder %s487_s17, 0  ;;  %s137_s2 = scalar_lea.sflag [#allocation4], %s136_s30 }
  0x50   : > { %p204_p3 = pnand %p209_p12, %p494_p2 }
  0x52   : > { %320 = dma.done.wait (!%p204_p3), %s137_s2, 128  }
  0x53   : > { %322 = vsyncadd (!%p204_p3), %s137_s2, 4294967168  ;;  %p12_p4 = scmp.ge.s32.totalorder %s376_s12, 6   ;;  %s495_s6 = smov %s329_s7 }
  0x54   : > { %s496_s7 = smov %s333_s8  ;;  %s497_s8 = smov %s387_s15 }
  0x55   : > { %s498_s9 = smov %s376_s12  ;;  %14 = sbr.rel (!%p12_p4) target bundleno = 4 (0x4), region = 61 }
  0x5c   :  { %142 = vsyncpa [#allocation3], 1 }
  0x5d   :  { %144 = vsyncpa [#allocation3 + $0x1], 1 }
  0x5e   :  { %145 = vsyncpa [#allocation4], 1 }
  0x5f   :  { %147 = vsyncpa [#allocation4 + $0x1], 1 }

// kernel: _lambda_.4
= control target key start
LH: loop header
LB: loop body
LE: loop exit
PB: predicated region body
PF: predicated region fallthrough
CT: control target
= control target key end

     0   :  { %s638_s1 = inlined_call_operand.vmem [shape: bf16[512,128], index: 1, kind: input, shape index: {}]   ;;  %s639_s0 = inlined_call_operand.vmem [shape: f32[16,512], index: 0, kind: input, shape index: {}]   ;;  %s640_s2 = inlined_call_operand.vmem [shape: f32[1,128], index: 2, kind: input, shape index: {}]   ;;  %s641_s3 = inlined_call_operand.vmem [shape: f32[16,128], index: 3, kind: output, shape index: {}]  }
   0x1   :  { %v457_v0 = vld [vmem:[%s638_s1 + $0x40] sm:$0xff]   ;;  %v461_v4 = vld [vmem:[%s638_s1 + $0x48] sm:$0xff]   ;;  %v465_v8 = vld [vmem:[%s638_s1 + $0x50] sm:$0xff]  }
   0x2   :  { %v458_v1 = vld [vmem:[%s638_s1 + $0xc0] sm:$0xff]   ;;  %413 = vmatprep.subr.bf16.mxu0 %v457_v0  ;;  %v462_v5 = vld [vmem:[%s638_s1 + $0xc8] sm:$0xff]   ;;  %v466_v9 = vld [vmem:[%s638_s1 + $0xd0] sm:$0xff]  }
   0x3   :  { %v459_v2 = vld [vmem:[%s638_s1] sm:$0xff]   ;;  %435 = vmatprep.subr.bf16.mxu1 %v458_v1  ;;  %v463_v6 = vld [vmem:[%s638_s1 + $0x8] sm:$0xff]   ;;  %v467_v10 = vld [vmem:[%s638_s1 + $0x10] sm:$0xff]  }
   0x4   :  { %v460_v3 = vld [vmem:[%s638_s1 + $0x80] sm:$0xff]   ;;  %414 = vmatpush3.bf16.msra.mxu0 %v459_v2  ;;  %v464_v7 = vld [vmem:[%s638_s1 + $0x88] sm:$0xff]   ;;  %v468_v11 = vld [vmem:[%s638_s1 + $0x90] sm:$0xff]  }
   0x5   :  { %436 = vmatpush3.bf16.msra.mxu1 %v460_v3  ;;  %415 = vmatprep.subr.bf16.mxu0 %v461_v4  ;;  %v469_v12 = vld [vmem:[%s638_s1 + $0x58] sm:$0xff]   ;;  %v473_v16 = vld [vmem:[%s638_s1 + $0x60] sm:$0xff]   ;;  %v477_v20 = vld [vmem:[%s638_s1 + $0x68] sm:$0xff]  }
   0x6   :  { %437 = vmatprep.subr.bf16.mxu1 %v462_v5  ;;  %v470_v13 = vld [vmem:[%s638_s1 + $0xd8] sm:$0xff]   ;;  %v474_v17 = vld [vmem:[%s638_s1 + $0xe0] sm:$0xff]   ;;  %v478_v21 = vld [vmem:[%s638_s1 + $0xe8] sm:$0xff]  }
   0x7   :  { %v471_v14 = vld [vmem:[%s638_s1 + $0x18] sm:$0xff]   ;;  %v475_v18 = vld [vmem:[%s638_s1 + $0x20] sm:$0xff]   ;;  %v479_v22 = vld [vmem:[%s638_s1 + $0x28] sm:$0xff]  }
   0x8   :  { %416 = vmatpush3.bf16.msra.mxu0 %v463_v6  ;;  %v472_v15 = vld [vmem:[%s638_s1 + $0x98] sm:$0xff]   ;;  %v476_v19 = vld [vmem:[%s638_s1 + $0xa0] sm:$0xff]   ;;  %v480_v23 = vld [vmem:[%s638_s1 + $0xa8] sm:$0xff]  }
   0x9   :  { %438 = vmatpush3.bf16.msra.mxu1 %v464_v7  ;;  %417 = vmatprep.subr.bf16.mxu0 %v465_v8  ;;  %v481_v24 = vld [vmem:[%s638_s1 + $0x70] sm:$0xff]   ;;  %v485_v28 = vld [vmem:[%s638_s1 + $0x78] sm:$0xff]   ;;  %v16_v32 = vld [vmem:[%s639_s0 + $0x8] sm:$0xff] }
   0xa   :  { %439 = vmatprep.subr.bf16.mxu1 %v466_v9  ;;  %v482_v25 = vld [vmem:[%s638_s1 + $0xf0] sm:$0xff]   ;;  %v486_v29 = vld [vmem:[%s638_s1 + $0xf8] sm:$0xff]   ;;  %v20_v33 = vld [vmem:[%s639_s0 + $0x28] sm:$0xff] }
   0xb   :  { %v483_v26 = vld [vmem:[%s638_s1 + $0x30] sm:$0xff]   ;;  %v487_v30 = vld [vmem:[%s638_s1 + $0x38] sm:$0xff]   ;;  %v89_v35 = vpack.c.bf16 %v20_v33, %v16_v32  ;;  %v15_v37 = vld [vmem:[%s639_s0] sm:$0xff] }
   0xc   :  { %418 = vmatpush3.bf16.msra.mxu0 %v467_v10  ;;  %v484_v27 = vld [vmem:[%s638_s1 + $0xb0] sm:$0xff]   ;;  %v488_v31 = vld [vmem:[%s638_s1 + $0xb8] sm:$0xff]   ;;  %v19_v38 = vld [vmem:[%s639_s0 + $0x20] sm:$0xff] }
   0xd   :  { %440 = vmatpush3.bf16.msra.mxu1 %v468_v11  ;;  %419 = vmatprep.subr.bf16.mxu0 %v469_v12  ;;  %v18_v34 = vld [vmem:[%s639_s0 + $0x18] sm:$0xff]  ;;  %v88_v40 = vpack.c.bf16 %v19_v38, %v15_v37  ;;  %v17_v41 = vld [vmem:[%s639_s0 + $0x10] sm:$0xff]  ;;  %v380_v46 = vld [vmem:[%s640_s2] ss:$0 sm:$0xff] }
   0xe   :  { %441 = vmatprep.subr.bf16.mxu1 %v470_v13  ;;  %v22_v36 = vld [vmem:[%s639_s0 + $0x38] sm:$0xff]  ;;  %v21_v42 = vld [vmem:[%s639_s0 + $0x30] sm:$0xff]  ;;  %322 = vmatprep.mubr.bf16.mxu0 %v89_v35 }
   0xf   :  { %v91_v39 = vpack.c.bf16 %v22_v36, %v18_v34  ;;  %v90_v43 = vpack.c.bf16 %v21_v42, %v17_v41 }
  0x10   :  { %420 = vmatpush3.bf16.msra.mxu0 %v471_v14 }
  0x11   :  { %442 = vmatpush3.bf16.msra.mxu1 %v472_v15  ;;  %421 = vmatprep.subr.bf16.mxu0 %v473_v16 }
  0x12   :  { %443 = vmatprep.subr.bf16.mxu1 %v474_v17  ;;  %363 = vmatprep.mubr.bf16.mxu1 %v91_v39 }
  0x14   :  { %422 = vmatpush3.bf16.msra.mxu0 %v475_v18 }
  0x15   :  { %444 = vmatpush3.bf16.msra.mxu1 %v476_v19  ;;  %423 = vmatprep.subr.bf16.mxu0 %v477_v20 }
  0x16   :  { %445 = vmatprep.subr.bf16.mxu1 %v478_v21 }
  0x18   :  { %424 = vmatpush3.bf16.msra.mxu0 %v479_v22 }
  0x19   :  { %446 = vmatpush3.bf16.msra.mxu1 %v480_v23  ;;  %425 = vmatprep.subr.bf16.mxu0 %v481_v24 }
  0x1a   :  { %447 = vmatprep.subr.bf16.mxu1 %v482_v25 }
  0x1c   :  { %426 = vmatpush3.bf16.msra.mxu0 %v483_v26 }
  0x1d   :  { %448 = vmatpush3.bf16.msra.mxu1 %v484_v27  ;;  %427 = vmatprep.subr.bf16.mxu0 %v485_v28 }
  0x1e   :  { %449 = vmatprep.subr.bf16.mxu1 %v486_v29 }
  0x20   :  { %428 = vmatpush3.bf16.msra.mxu0 %v487_v30 }
  0x21   :  { %450 = vmatpush3.bf16.msra.mxu1 %v488_v31 }
  0x23   :  { %323 = vmatmul.mubr.bf16.vlgmr.msra.gmra.mrb[0].mxu0 %v88_v40 }
  0x24   :  { %364 = vmatmul.mubr.bf16.vlgmr.msra.gmra.mrb[0].mxu1 %v90_v43 }
  0xf6   :  { %v429_v44 = vpop.f32.mrb[0].mxu0 }
  0xf7   :  { %v451_v45 = vpop.f32.mrb[0].mxu1  ;;  %v430_v47 = vpop.f32.mrb[1].mxu0 }
  0xf8   :  { %v431_v48 = vadd.f32 %v430_v47, %v429_v44  ;;  %v452_v49 = vpop.f32.mrb[1].mxu1  ;;  %v432_v50 = vpop.f32.mrb[2].mxu0 }
  0xf9   :  { %v453_v51 = vadd.f32 %v452_v49, %v451_v45  ;;  %v454_v52 = vpop.f32.mrb[2].mxu1  ;;  %v433_v53 = vpop.f32.mrb[3].mxu0 }
  0xfa   :  { %v325_v54 = vadd.f32 %v431_v48, %v380_v46  ;;  %v434_v55 = vadd.f32 %v433_v53, %v432_v50  ;;  %v455_v56 = vpop.f32.mrb[3].mxu1 }
  0xfb   :  { %v456_v57 = vadd.f32 %v455_v56, %v454_v52 }
  0xfc   :  { %v366_v58 = vadd.f32 %v453_v51, %v325_v54  ;;  %v328_v59 = vadd.f32 %v434_v55, %v380_v46 }
  0xfe   :  { %v372_v60 = vmax.f32 %v366_v58, 0.0  ;;  %v369_v61 = vadd.f32 %v456_v57, %v328_v59 }
 0x100   :  { %374 = vst [vmem:[%s641_s3] sm:$0xff] %v372_v60  ;;  %v373_v62 = vmax.f32 %v369_v61, 0.0 }
 0x102   :  { %375 = vst [vmem:[%s641_s3 + $0x8] sm:$0xff] %v373_v62 }

// kernel: _lambda_.3
= control target key start
LH: loop header
LB: loop body
LE: loop exit
PB: predicated region body
PF: predicated region fallthrough
CT: control target
= control target key end

     0   :  { %s2076_s27 = smov 0   ;;  %s2078_s28 = smov 0   ;;  %s2482_s0 = inlined_call_operand.vmem [shape: f32[2,8,128], index: 0, kind: input, shape index: {}]   ;;  %s2483_s1 = inlined_call_operand.vmem [shape: f32[32,128], index: 1, kind: input, shape index: {}]   ;;  %s2484_s2 = inlined_call_operand.vmem [shape: bf16[128,128], index: 2, kind: input, shape index: {}]   ;;  %s2485_s3 = inlined_call_operand.vmem [shape: bf16[128,512], index: 3, kind: input, shape index: {}]   ;;  %s2486_s4 = inlined_call_operand.vmem [shape: bf16[128,512], index: 4, kind: input, shape index: {}]   ;;  %s2487_s5 = inlined_call_operand.vmem [shape: f32[1,512], index: 5, kind: input, shape index: {}]   ;;  %s2488_s6 = inlined_call_operand.vmem [shape: bf16[256,128], index: 6, kind: input, shape index: {}]   ;;  %s2489_s7 = inlined_call_operand.vmem [shape: f32[1,128], index: 7, kind: input, shape index: {}]   ;;  %s2490_s8 = inlined_call_operand.vmem [shape: f32[2,32,128], index: 8, kind: output, shape index: {}]  }
   0x1   :  { %s2080_s29 = smov 0  }
   0x2 LB: > { %s30_s30 = sadd.s32 1, %s2022_s28  ;;  %p1638_p0 = scmp.ge.s32.totalorder %s2026_s29, 1  ;;  %s2026_s29 = sphi %s2080_s29, %s18_s29   ;;  %s2022_s28 = sphi %s2078_s28, %s2492_s28   ;;  %s2018_s27 = sphi %s2076_s27, %s2491_s27  }
   0x3   : > { %p32_p1 = scmp.ge.s32.totalorder %s30_s30, 2  ;;  %p275_p2 = scmp.lt.s32.totalorder %s2026_s29, 3 }
   0x5   : > { %s2494_s30 = smov (%p32_p1, %s30_s30), 0  ;;  %p276_p3 = pnand %p1638_p0, %p275_p2 }
   0x6   : > { %v1868_v0 = vld [vmem:[%s2484_s2] sm:$0xff] (!%p276_p3)   ;;  %v2028_v1 = vmov (!%p276_p3), 0.0   ;;  %v1869_v2 = vld [vmem:[%s2484_s2 + $0x8] sm:$0xff] (!%p276_p3)   ;;  %vm2029_vm0 = vmmov (!%p276_p3), 0   ;;  %v2030_v3 = vmov (!%p276_p3), 0   ;;  %v1870_v4 = vld [vmem:[%s2484_s2 + $0x10] sm:$0xff] (!%p276_p3)  }
   0x7   : > { %279 = sbr.rel (%p276_p3) target bundleno = 1323 (0x52b), region = 52  ;;  %1769 = vmatprep.subr.bf16.mxu0 (!%p276_p3), %v2028_v1  ;;  %1785 = vmatprep.mubr.msk.bf16.mxu0 (!%p276_p3), %vm2029_vm0, %v2028_v1  ;;  %v1876_v5 = vld [vmem:[%s2485_s3 + $0x4] ss:$16 sps:$4 sm:$0xff] (!%p276_p3)   ;;  %v1878_v6 = vld [vmem:[%s2485_s3] ss:$16 sps:$4 sm:$0xff] (!%p276_p3)   ;;  %v1871_v7 = vld [vmem:[%s2484_s2 + $0x18] sm:$0xff] (!%p276_p3)  }
   0x8   : > { %1770 = vmatpush3.bf16.msra.mxu0 (!%p276_p3), %v1868_v0  ;;  %661 = vmatprep.mubr.bf16.mxu1 (!%p276_p3), %v2030_v3  ;;  %v1882_v8 = vld [vmem:[%s2485_s3 + $0x24] ss:$16 sps:$4 sm:$0xff] (!%p276_p3)   ;;  %p312_p4 = scmp.lt.s32.totalorder (!%p276_p3), %s2018_s27, 1  ;;  %v1884_v9 = vld [vmem:[%s2485_s3 + $0x20] ss:$16 sps:$4 sm:$0xff] (!%p276_p3)   ;;  %v1873_v14 = vld [vmem:[%s2484_s2 + $0x28] sm:$0xff] (!%p276_p3)  }
   0x9   : > { %1771 = vmatprep.subr.bf16.mxu0 (!%p276_p3), %v2028_v1  ;;  %629 = vmatprep.subr.bf16.mxu1 (!%p276_p3), %v1876_v5  ;;  %v1872_v10 = vld [vmem:[%s2484_s2 + $0x20] sm:$0xff] (!%p276_p3)   ;;  %v1874_v17 = vld [vmem:[%s2484_s2 + $0x30] sm:$0xff] (!%p276_p3)   ;;  %v1875_v20 = vld [vmem:[%s2484_s2 + $0x38] sm:$0xff] (!%p276_p3)   ;;  %vm1176_vm1 = vcmask (!%p276_p3), 261120  }
   0xa   : > { %630 = vmatpush1.bf16.msra.mxu1 (!%p276_p3), %v1878_v6  ;;  %v1888_v11 = vld [vmem:[%s2485_s3 + $0x44] ss:$16 sps:$4 sm:$0xff] (!%p276_p3)   ;;  %v1890_v12 = vld [vmem:[%s2485_s3 + $0x40] ss:$16 sps:$4 sm:$0xff] (!%p276_p3)   ;;  %v1881_v22 = vld [vmem:[%s2485_s3 + $0xc] ss:$16 sps:$4 sm:$0xff] (!%p276_p3)  }
   0xb   : > { %631 = vmatprep.subr.bf16.mxu1 (!%p276_p3), %v1882_v8  ;;  %v1894_v13 = vld [vmem:[%s2485_s3 + $0x64] ss:$16 sps:$4 sm:$0xff] (!%p276_p3)   ;;  %v1896_v15 = vld [vmem:[%s2485_s3 + $0x60] ss:$16 sps:$4 sm:$0xff] (!%p276_p3)   ;;  %v1879_v26 = vld [vmem:[%s2485_s3 + $0x8] ss:$16 sps:$4 sm:$0xff] (!%p276_p3)  }
   0xc   : > { %1772 = vmatpush3.bf16.msra.mxu0 (!%p276_p3), %v1869_v2  ;;  %v1900_v16 = vld [vmem:[%s2485_s3 + $0x84] ss:$16 sps:$4 sm:$0xff] (!%p276_p3)   ;;  %v1902_v18 = vld [vmem:[%s2485_s3 + $0x80] ss:$16 sps:$4 sm:$0xff] (!%p276_p3)   ;;  %v1887_v27 = vld [vmem:[%s2485_s3 + $0x2c] ss:$16 sps:$4 sm:$0xff] (!%p276_p3)  }
   0xd   : > { %1773 = vmatprep.subr.bf16.mxu0 (!%p276_p3), %v2028_v1  ;;  %v1906_v19 = vld [vmem:[%s2485_s3 + $0xa4] ss:$16 sps:$4 sm:$0xff] (!%p276_p3)   ;;  %v1908_v23 = vld [vmem:[%s2485_s3 + $0xa0] ss:$16 sps:$4 sm:$0xff] (!%p276_p3)   ;;  %v1885_v30 = vld [vmem:[%s2485_s3 + $0x28] ss:$16 sps:$4 sm:$0xff] (!%p276_p3)  }
   0xe   : > { %s2496_s27 = smov (!%p312_p4, %s2018_s27), 1  ;;  %632 = vmatpush1.bf16.msra.mxu1 %v1884_v9  ;;  %v1912_v25 = vld [vmem:[%s2485_s3 + $0xc4] ss:$16 sps:$4 sm:$0xff]   ;;  %v1914_v28 = vld [vmem:[%s2485_s3 + $0xc0] ss:$16 sps:$4 sm:$0xff]  }
   0xf   : > { %633 = vmatprep.subr.bf16.mxu1 %v1888_v11  ;;  %s1639_s17 = sshll.u32 %s2496_s27, 3  ;;  %v1918_v29 = vld [vmem:[%s2485_s3 + $0xe4] ss:$16 sps:$4 sm:$0xff]   ;;  %v1893_v31 = vld [vmem:[%s2485_s3 + $0x4c] ss:$16 sps:$4 sm:$0xff]   ;;  %s1735_s21 = sshll.u32 %s2496_s27, 5 }
  0x10   : > { %1774 = vmatpush3.bf16.msra.mxu0 %v1870_v4  ;;  %s315_s26 = scalar_lea.vmem %s2482_s0, %s1639_s17  ;;  %v1920_v32 = vld [vmem:[%s2485_s3 + $0xe0] ss:$16 sps:$4 sm:$0xff]   ;;  %v1926_v33 = vld [vmem:[%s2486_s4 + $0x4] ss:$16 sps:$4 sm:$0xff]   ;;  %v1891_v34 = vld [vmem:[%s2485_s3 + $0x48] ss:$16 sps:$4 sm:$0xff]   ;;  %s324_s24 = scalar_lea.vmem %s2490_s8, %s1735_s21 }
  0x11   : > { %1775 = vmatprep.subr.bf16.mxu0 %v2028_v1  ;;  %v2162_v21 = vld [vmem:[%s315_s26] sm:$0xff]  ;;  %v1899_v35 = vld [vmem:[%s2485_s3 + $0x6c] ss:$16 sps:$4 sm:$0xff]   ;;  %v1897_v38 = vld [vmem:[%s2485_s3 + $0x68] ss:$16 sps:$4 sm:$0xff]  }
  0x12   : > { %634 = vmatpush1.bf16.msra.mxu1 %v1890_v12  ;;  %v2172_v24 = vpack.c.bf16 %v2162_v21, %v2162_v21  ;;  %v1924_v36 = vld [vmem:[%s2486_s4] ss:$16 sps:$4 sm:$0xff]   ;;  %v1932_v37 = vld [vmem:[%s2486_s4 + $0x24] ss:$16 sps:$4 sm:$0xff]   ;;  %v1905_v39 = vld [vmem:[%s2485_s3 + $0x8c] ss:$16 sps:$4 sm:$0xff]  }
  0x13   : > { %635 = vmatprep.subr.bf16.mxu1 %v1894_v13  ;;  %v1930_v40 = vld [vmem:[%s2486_s4 + $0x20] ss:$16 sps:$4 sm:$0xff]   ;;  %v1938_v41 = vld [vmem:[%s2486_s4 + $0x44] ss:$16 sps:$4 sm:$0xff]   ;;  %v1903_v42 = vld [vmem:[%s2485_s3 + $0x88] ss:$16 sps:$4 sm:$0xff]  }
  0x14   : > { %1776 = vmatpush3.bf16.msra.mxu0 %v1871_v7  ;;  %v1911_v43 = vld [vmem:[%s2485_s3 + $0xac] ss:$16 sps:$4 sm:$0xff]   ;;  %v1936_v44 = vld [vmem:[%s2486_s4 + $0x40] ss:$16 sps:$4 sm:$0xff]   ;;  %v1909_v45 = vld [vmem:[%s2485_s3 + $0xa8] ss:$16 sps:$4 sm:$0xff]  }
  0x15   : > { %1777 = vmatprep.subr.bf16.mxu0 %v2028_v1  ;;  %v1944_v46 = vld [vmem:[%s2486_s4 + $0x64] ss:$16 sps:$4 sm:$0xff]   ;;  %v1917_v47 = vld [vmem:[%s2485_s3 + $0xcc] ss:$16 sps:$4 sm:$0xff]   ;;  %v1942_v48 = vld [vmem:[%s2486_s4 + $0x60] ss:$16 sps:$4 sm:$0xff]  }
  0x16   : > { %636 = vmatpush1.bf16.msra.mxu1 %v1896_v15  ;;  %v1950_v49 = vld [vmem:[%s2486_s4 + $0x84] ss:$16 sps:$4 sm:$0xff]   ;;  %v1915_v50 = vld [vmem:[%s2485_s3 + $0xc8] ss:$16 sps:$4 sm:$0xff]   ;;  %v1923_v51 = vld [vmem:[%s2485_s3 + $0xec] ss:$16 sps:$4 sm:$0xff]  }
  0x17   : > { %637 = vmatprep.subr.bf16.mxu1 %v1900_v16  ;;  %v1948_v52 = vld [vmem:[%s2486_s4 + $0x80] ss:$16 sps:$4 sm:$0xff]   ;;  %v1956_v53 = vld [vmem:[%s2486_s4 + $0xa4] ss:$16 sps:$4 sm:$0xff]   ;;  %v1921_v54 = vld [vmem:[%s2485_s3 + $0xe8] ss:$16 sps:$4 sm:$0xff]  }
  0x18   : > { %1778 = vmatpush3.bf16.msra.mxu0 %v1872_v10  ;;  %v1929_v55 = vld [vmem:[%s2486_s4 + $0xc] ss:$16 sps:$4 sm:$0xff]   ;;  %v1954_v56 = vld [vmem:[%s2486_s4 + $0xa0] ss:$16 sps:$4 sm:$0xff]   ;;  %v1962_v57 = vld [vmem:[%s2486_s4 + $0xc4] ss:$16 sps:$4 sm:$0xff]  }
  0x19   : > { %1779 = vmatprep.subr.bf16.mxu0 %v2028_v1  ;;  %v1927_v58 = vld [vmem:[%s2486_s4 + $0x8] ss:$16 sps:$4 sm:$0xff]   ;;  %v1935_v59 = vld [vmem:[%s2486_s4 + $0x2c] ss:$16 sps:$4 sm:$0xff]   ;;  %v1960_v60 = vld [vmem:[%s2486_s4 + $0xc0] ss:$16 sps:$4 sm:$0xff]  }
  0x1a   : > { %638 = vmatpush1.bf16.msra.mxu1 %v1902_v18  ;;  %v1933_v61 = vld [vmem:[%s2486_s4 + $0x28] ss:$16 sps:$4 sm:$0xff]   ;;  %v1941_v62 = vld [vmem:[%s2486_s4 + $0x4c] ss:$16 sps:$4 sm:$0xff]   ;;  %v1968_v9 = vld [vmem:[%s2486_s4 + $0xe4] ss:$16 sps:$4 sm:$0xff]  }
  0x1b   : > { %639 = vmatprep.subr.bf16.mxu1 %v1906_v19  ;;  %v1939_v63 = vld [vmem:[%s2486_s4 + $0x48] ss:$16 sps:$4 sm:$0xff]   ;;  %v1947_v0 = vld [vmem:[%s2486_s4 + $0x6c] ss:$16 sps:$4 sm:$0xff]   ;;  %v1966_v11 = vld [vmem:[%s2486_s4 + $0xe0] ss:$16 sps:$4 sm:$0xff]  }
  0x1c   : > { %1780 = vmatpush3.bf16.msra.mxu0 %v1873_v14  ;;  %v1953_v2 = vld [vmem:[%s2486_s4 + $0x8c] ss:$16 sps:$4 sm:$0xff]   ;;  %v1951_v4 = vld [vmem:[%s2486_s4 + $0x88] ss:$16 sps:$4 sm:$0xff]   ;;  %v711_v13 = vld [vmem:[%s2483_s1] sm:$0xff] }
  0x1d   : > { %1781 = vmatprep.subr.bf16.mxu0 %v2028_v1  ;;  %v1959_v5 = vld [vmem:[%s2486_s4 + $0xac] ss:$16 sps:$4 sm:$0xff]   ;;  %v1957_v6 = vld [vmem:[%s2486_s4 + $0xa8] ss:$16 sps:$4 sm:$0xff]   ;;  %v713_v19 = vld [vmem:[%s2483_s1 + $0x10] sm:$0xff] }
  0x1e   : > { %640 = vmatpush1.bf16.msra.mxu1 %v1908_v23  ;;  %v1965_v7 = vld [vmem:[%s2486_s4 + $0xcc] ss:$16 sps:$4 sm:$0xff]   ;;  %v1963_v8 = vld [vmem:[%s2486_s4 + $0xc8] ss:$16 sps:$4 sm:$0xff]  }
  0x1f   : > { %641 = vmatprep.subr.bf16.mxu1 %v1912_v25  ;;  %v1971_v10 = vld [vmem:[%s2486_s4 + $0xec] ss:$16 sps:$4 sm:$0xff]   ;;  %v1969_v12 = vld [vmem:[%s2486_s4 + $0xe8] ss:$16 sps:$4 sm:$0xff]  }
  0x20   : > { %1782 = vmatpush3.bf16.msra.mxu0 %v1874_v17  ;;  %v712_v14 = vld [vmem:[%s2483_s1 + $0x8] sm:$0xff] }
  0x21   : > { %1783 = vmatprep.subr.bf16.mxu0 %v2028_v1  ;;  %v1945_v1 = vld [vmem:[%s2486_s4 + $0x68] ss:$16 sps:$4 sm:$0xff]  }
  0x22   : > { %642 = vmatpush1.bf16.msra.mxu1 %v1914_v28 }
  0x23   : > { %643 = vmatprep.subr.bf16.mxu1 %v1918_v29 }
  0x24   : > { %1784 = vmatpush3.bf16.msra.mxu0 %v1875_v20  ;;  %v714_v20 = vld [vmem:[%s2483_s1 + $0x18] sm:$0xff] }
  0x25   : > { %670 = vmatprep.subr.bf16.mxu0 %v1881_v22 }
  0x26   : > { %644 = vmatpush1.bf16.msra.mxu1 %v1920_v32 }
  0x27   : > { %1786 = vmatmul.mubr.bf16.vlgmr.msra.gmra.mrb[0].mxu0 %v2172_v24  ;;  %921 = vmatprep.subr.bf16.mxu1 %v1926_v33 }
  0x28   : > { %671 = vmatpush1.bf16.msra.mxu0 %v1879_v26  ;;  %702 = vmatprep.mubr.bf16.mxu0 %v2030_v3 }
  0x29   : > { %672 = vmatprep.subr.bf16.mxu0 %v1887_v27  ;;  %662 = vmatmul.mubr.bf16.vlgmr.msra.gmra.mrb[0].mxu1 %v2172_v24 }
  0x2a   : > { %922 = vmatpush1.bf16.msra.mxu1 %v1924_v36  ;;  %953 = vmatprep.mubr.bf16.mxu1 %v2030_v3 }
  0x2b   : > { %923 = vmatprep.subr.bf16.mxu1 %v1932_v37 }
  0x2c   : > { %673 = vmatpush1.bf16.msra.mxu0 %v1885_v30 }
  0x2d   : > { %674 = vmatprep.subr.bf16.mxu0 %v1893_v31 }
  0x2e   : > { %924 = vmatpush1.bf16.msra.mxu1 %v1930_v40  ;;  %v1045_v40 = vlaneseq }
  0x2f   : > { %925 = vmatprep.subr.bf16.mxu1 %v1938_v41 }
  0x30   : > { %675 = vmatpush1.bf16.msra.mxu0 %v1891_v34  ;;  %v1046_v41 = vshrl.u32 %v1045_v40, 7 }
  0x31   : > { %676 = vmatprep.subr.bf16.mxu0 %v1899_v35 }
  0x32   : > { %926 = vmatpush1.bf16.msra.mxu1 %v1936_v44  ;;  %v1043_v44 = vld [vmem:[%s2487_s5] sm:$0xf] }
  0x33   : > { %927 = vmatprep.subr.bf16.mxu1 %v1944_v46  ;;  %v1059_v46 = vsub.s32 3, %v1046_v41 }
  0x34   : > { %677 = vmatpush1.bf16.msra.mxu0 %v1897_v38 }
  0x35   : > { %678 = vmatprep.subr.bf16.mxu0 %v1905_v39 }
  0x36   : > { %928 = vmatpush1.bf16.msra.mxu1 %v1942_v48 }
  0x37   : > { %929 = vmatprep.subr.bf16.mxu1 %v1950_v49 }
  0x38   : > { %679 = vmatpush1.bf16.msra.mxu0 %v1903_v42  ;;  %v1047_v42 = vsub.s32 0, %v1046_v41 }
  0x39   : > { %680 = vmatprep.subr.bf16.mxu0 %v1911_v43  ;;  %v1055_v43 = vsub.s32 2, %v1046_v41 }
  0x3a   : > { %930 = vmatpush1.bf16.msra.mxu1 %v1948_v52  ;;  %v1060_v52 = vrot.slane %v1043_v44, %v1059_v46 }
  0x3b   : > { %931 = vmatprep.subr.bf16.mxu1 %v1956_v53  ;;  %v1056_v48 = vrot.slane %v1043_v44, %v1055_v43 }
  0x3c   : > { %681 = vmatpush1.bf16.msra.mxu0 %v1909_v45  ;;  %v1051_v45 = vsub.s32 1, %v1046_v41 }
  0x3d   : > { %682 = vmatprep.subr.bf16.mxu0 %v1917_v47  ;;  %v1048_v47 = vrot.slane %v1043_v44, %v1047_v42 }
  0x3e   : > { %932 = vmatpush1.bf16.msra.mxu1 %v1954_v56 }
  0x3f   : > { %933 = vmatprep.subr.bf16.mxu1 %v1962_v57 }
  0x40   : > { %683 = vmatpush1.bf16.msra.mxu0 %v1915_v50 }
  0x41   : > { %684 = vmatprep.subr.bf16.mxu0 %v1923_v51  ;;  %v1052_v51 = vrot.slane %v1043_v44, %v1051_v45 }
  0x42   : > { %934 = vmatpush1.bf16.msra.mxu1 %v1960_v60 }
  0x43   : > { %935 = vmatprep.subr.bf16.mxu1 %v1968_v9 }
  0x44   : > { %685 = vmatpush1.bf16.msra.mxu0 %v1921_v54 }
  0x45   : > { %974 = vmatprep.subr.bf16.mxu0 %v1929_v55 }
  0x46   : > { %936 = vmatpush1.bf16.msra.mxu1 %v1966_v11 }
  0x47   : > { %703 = vmatmul.mubr.bf16.vlgmr.msra.gmra.mrb[4].mxu0 %v2172_v24 }
  0x48   : > { %975 = vmatpush1.bf16.msra.mxu0 %v1927_v58  ;;  %1006 = vmatprep.mubr.bf16.mxu0 %v2030_v3 }
  0x49   : > { %976 = vmatprep.subr.bf16.mxu0 %v1935_v59 }
  0x4c   : > { %977 = vmatpush1.bf16.msra.mxu0 %v1933_v61 }
  0x4d   : > { %978 = vmatprep.subr.bf16.mxu0 %v1941_v62 }
  0x50   : > { %979 = vmatpush1.bf16.msra.mxu0 %v1939_v63 }
  0x51   : > { %980 = vmatprep.subr.bf16.mxu0 %v1947_v0 }
  0x54   : > { %981 = vmatpush1.bf16.msra.mxu0 %v1945_v1 }
  0x55   : > { %982 = vmatprep.subr.bf16.mxu0 %v1953_v2 }
  0x58   : > { %983 = vmatpush1.bf16.msra.mxu0 %v1951_v4 }
  0x59   : > { %984 = vmatprep.subr.bf16.mxu0 %v1959_v5 }
  0x5c   : > { %985 = vmatpush1.bf16.msra.mxu0 %v1957_v6 }
  0x5d   : > { %986 = vmatprep.subr.bf16.mxu0 %v1965_v7 }
  0x60   : > { %987 = vmatpush1.bf16.msra.mxu0 %v1963_v8 }
  0x61   : > { %988 = vmatprep.subr.bf16.mxu0 %v1971_v10 }
  0x64   : > { %989 = vmatpush1.bf16.msra.mxu0 %v1969_v12 }
  0xfa   : > { %v431_v15 = vpop.f32.mrb[0].mxu0 }
  0xfb   : > { %v2339_v16 = vadd.f32 %v711_v13, %v431_v15  ;;  %v2341_v17 = vadd.f32 %v712_v14, %v431_v15  ;;  %v1787_v18 = vpop.f32.mrb[1].mxu0  ;;  %v2351_v26 = vadd.f32 %v713_v19, %v431_v15  ;;  %v2353_v27 = vadd.f32 %v714_v20, %v431_v15 }
  0xfc   : > { %v434_v22 = vpop.f32.mrb[2].mxu0  ;;  %v2363_v31 = vpop.f32.mrb[0].mxu1 }
  0xfd   : > { %v719_v23 = vmax.f32 %v2339_v16, 0.0  ;;  %v720_v24 = vmax.f32 %v2341_v17, 0.0  ;;  %v1788_v25 = vpop.f32.mrb[3].mxu0  ;;  %v721_v29 = vmax.f32 %v2351_v26, 0.0  ;;  %v722_v30 = vmax.f32 %v2353_v27, 0.0  ;;  %v2365_v32 = vpop.f32.mrb[1].mxu1 }
  0xfe   : > { %v667_v33 = vpop.f32.mrb[2].mxu1 }
  0xff   : > { %v727_v28 = vpack.c.bf16 %v720_v24, %v719_v23  ;;  %v728_v34 = vpack.c.bf16 %v722_v30, %v721_v29  ;;  %v668_v35 = vpop.f32.mrb[3].mxu1 }
 0x101   : > { %954 = vmatmul.mubr.bf16.vlgmr.msra.gmra.mrb[4].mxu1 %v727_v28  ;;  %1007 = vmatmul.mubr.bf16.vlgmr.msra.gmra.mrb[8].mxu0 %v727_v28 }
 0x102   : > { %963 = vmatprep.mubr.bf16.mxu1 %v2030_v3  ;;  %1016 = vmatprep.mubr.bf16.mxu0 %v2030_v3 }
 0x109   : > { %964 = vmatmul.mubr.bf16.gmra.mrb[8].mxu1 %v728_v34  ;;  %1017 = vmatmul.mubr.bf16.gmra.mrb[12].mxu0 %v728_v34 }
 0x11a   : > { %v2371_v36 = vpop.f32.mrb[4].mxu0 }
 0x11b   : > { %v2373_v37 = vpop.f32.mrb[5].mxu0 }
 0x11c   : > { %v708_v38 = vpop.f32.mrb[6].mxu0 }
 0x11d   : > { %v709_v39 = vpop.f32.mrb[7].mxu0 }
 0x1d4   : > { %v955_v49 = vpop.f32.mrb[4].mxu1  ;;  %v1008_v50 = vpop.f32.mrb[8].mxu0 }
 0x1d5   : > { %v1027_v53 = vadd.f32 %v955_v49, %v2363_v31  ;;  %v1029_v54 = vadd.f32 %v1008_v50, %v2371_v36  ;;  %v957_v55 = vpop.f32.mrb[5].mxu1  ;;  %v1010_v56 = vpop.f32.mrb[9].mxu0 }
 0x1d6   : > { %v1028_v57 = vadd.f32 %v957_v55, %v2365_v32  ;;  %v1030_v58 = vadd.f32 %v1010_v56, %v2373_v37  ;;  %v959_v59 = vpop.f32.mrb[6].mxu1  ;;  %v1012_v60 = vpop.f32.mrb[10].mxu0 }
 0x1d7   : > { %v1065_v61 = vadd.f32 %v1048_v47, %v1027_v53  ;;  %v1067_v62 = vadd.f32 %v1056_v48, %v1029_v54  ;;  %v1031_v63 = vadd.f32 %v959_v59, %v2363_v31  ;;  %v1033_v0 = vadd.f32 %v1012_v60, %v2371_v36  ;;  %v961_v1 = vpop.f32.mrb[7].mxu1  ;;  %v1014_v2 = vpop.f32.mrb[11].mxu0 }
 0x1d8   : > { %v1066_v4 = vadd.f32 %v1052_v51, %v1028_v57  ;;  %v1068_v5 = vadd.f32 %v1060_v52, %v1030_v58  ;;  %v1032_v6 = vadd.f32 %v961_v1, %v2365_v32  ;;  %v1034_v7 = vadd.f32 %v1014_v2, %v2373_v37 }
 0x1d9   : > { %v1069_v8 = vadd.f32 %v1048_v47, %v1031_v63  ;;  %v1071_v9 = vadd.f32 %v1056_v48, %v1033_v0  ;;  %v1081_v12 = vmax.f32 %v1065_v61, 0.0  ;;  %v1083_v13 = vmax.f32 %v1067_v62, 0.0 }
 0x1da   : > { %v1070_v10 = vadd.f32 %v1052_v51, %v1032_v6  ;;  %v1072_v11 = vadd.f32 %v1060_v52, %v1034_v7  ;;  %v1082_v18 = vmax.f32 %v1066_v4, 0.0  ;;  %v1084_v19 = vmax.f32 %v1068_v5, 0.0 }
 0x1db   : > { %v1085_v14 = vmax.f32 %v1069_v8, 0.0  ;;  %v1087_v15 = vmax.f32 %v1071_v9, 0.0 }
 0x1dc   : > { %v1086_v20 = vmax.f32 %v1070_v10, 0.0  ;;  %v1088_v22 = vmax.f32 %v1072_v11, 0.0  ;;  %v965_v25 = vpop.f32.mrb[8].mxu1  ;;  %v1018_v28 = vpop.f32.mrb[12].mxu0 }
 0x1dd   : > { %v1099_v33 = vpack.c.bf16 %v1087_v15, %v1083_v13  ;;  %v1035_v34 = vadd.f32 %v965_v25, %v2363_v31  ;;  %v1037_v35 = vadd.f32 %v1018_v28, %v2371_v36  ;;  %v967_v38 = vpop.f32.mrb[9].mxu1  ;;  %v1020_v39 = vpop.f32.mrb[13].mxu0  ;;  %v1097_v40 = vpack.c.bf16 %v1085_v14, %v1081_v12 }
 0x1de   : > { %v1036_v41 = vadd.f32 %v967_v38, %v2365_v32  ;;  %v1038_v42 = vadd.f32 %v1020_v39, %v2373_v37  ;;  %v969_v43 = vpop.f32.mrb[10].mxu1  ;;  %v1022_v44 = vpop.f32.mrb[14].mxu0  ;;  %v1098_v45 = vpack.c.bf16 %v1086_v20, %v1082_v18  ;;  %v1100_v46 = vpack.c.bf16 %v1088_v22, %v1084_v19 }
 0x1df   : > { %v1073_v49 = vadd.f32 %v1048_v47, %v1035_v34  ;;  %v1075_v50 = vadd.f32 %v1056_v48, %v1037_v35  ;;  %v1039_v53 = vadd.f32 %v969_v43, %v2363_v31  ;;  %v1041_v54 = vadd.f32 %v1022_v44, %v2371_v36  ;;  %v971_v55 = vpop.f32.mrb[11].mxu1  ;;  %v1024_v56 = vpop.f32.mrb[15].mxu0  ;;  %1789 = vmatprep.subr.bf16.mxu1 %v1097_v40 }
 0x1e0   : > { %v1074_v57 = vadd.f32 %v1052_v51, %v1036_v41  ;;  %v1076_v58 = vadd.f32 %v1060_v52, %v1038_v42  ;;  %v1040_v59 = vadd.f32 %v971_v55, %v2365_v32  ;;  %v1042_v60 = vadd.f32 %v1024_v56, %v2373_v37  ;;  %1790 = vmatpush3.bf16.xpose.msra.mxu1 %v1097_v40  ;;  %v1974_v55 = vld [vmem:[%s2488_s6 + $0x8] sm:$0xff]   ;;  %v1976_v56 = vld [vmem:[%s2488_s6 + $0x10] sm:$0xff]  }
 0x1e1   : > { %v1077_v61 = vadd.f32 %v1048_v47, %v1039_v53  ;;  %v1079_v62 = vadd.f32 %v1056_v48, %v1041_v54  ;;  %1793 = vmatprep.mubr.bf16.mxu1 %v1098_v45  ;;  %v1089_v1 = vmax.f32 %v1073_v49, 0.0  ;;  %v1091_v2 = vmax.f32 %v1075_v50, 0.0  ;;  %v1972_v53 = vld [vmem:[%s2488_s6] sm:$0xff]  }
 0x1e2   : > { %v1078_v63 = vadd.f32 %v1052_v51, %v1040_v59  ;;  %v1080_v0 = vadd.f32 %v1060_v52, %v1042_v60  ;;  %v1090_v36 = vmax.f32 %v1074_v57, 0.0  ;;  %v1092_v5 = vmax.f32 %v1076_v58, 0.0  ;;  %v1973_v54 = vld [vmem:[%s2488_s6 + $0x40] sm:$0xff]   ;;  %v1977_v57 = vld [vmem:[%s2488_s6 + $0x50] sm:$0xff]   ;;  %v1978_v58 = vld [vmem:[%s2488_s6 + $0x18] sm:$0xff]  }
 0x1e3   : > { %v1093_v31 = vmax.f32 %v1077_v61, 0.0  ;;  %v1095_v4 = vmax.f32 %v1079_v62, 0.0  ;;  %1797 = vmatprep.subr.bf16.mxu0 %v1973_v54  ;;  %v1979_v59 = vld [vmem:[%s2488_s6 + $0x58] sm:$0xff]   ;;  %v1980_v60 = vld [vmem:[%s2488_s6 + $0x20] sm:$0xff]   ;;  %v1982_v62 = vld [vmem:[%s2488_s6 + $0x28] sm:$0xff]  }
 0x1e4   : > { %v1094_v6 = vmax.f32 %v1078_v63, 0.0  ;;  %v1096_v7 = vmax.f32 %v1080_v0, 0.0  ;;  %1798 = vmatpush3.bf16.msra.mxu0 %v1973_v54  ;;  %v1981_v61 = vld [vmem:[%s2488_s6 + $0x60] sm:$0xff]   ;;  %v1983_v63 = vld [vmem:[%s2488_s6 + $0x68] sm:$0xff]   ;;  %v1984_v0 = vld [vmem:[%s2488_s6 + $0x30] sm:$0xff]  }
 0x1e5   : > { %v1103_v8 = vpack.c.bf16 %v1095_v4, %v1091_v2  ;;  %v1101_v9 = vpack.c.bf16 %v1093_v31, %v1089_v1  ;;  %v1985_v1 = vld [vmem:[%s2488_s6 + $0x70] sm:$0xff]   ;;  %v1986_v2 = vld [vmem:[%s2488_s6 + $0x38] sm:$0xff]  }
 0x1e6   : > { %v1102_v10 = vpack.c.bf16 %v1094_v6, %v1090_v36  ;;  %v1104_v32 = vpack.c.bf16 %v1096_v7, %v1092_v5  ;;  %v1987_v31 = vld [vmem:[%s2488_s6 + $0x78] sm:$0xff]  }
 0x1e7   : > { %1791 = vmatprep.subr.bf16.mxu1 %v1101_v9 }
 0x1e8   : > { %1792 = vmatpush3.bf16.xpose.msra.mxu1 %v1101_v9 }
 0x1e9   : > { %1221 = vmatprep.subr.bf16.mxu1 %v1100_v46 }
 0x1ef   : > { %1794 = vmatmul.mubr.bf16.vlgmr.msra.gmra.mrb[12].mxu1 %v1102_v10 }
 0x1f0   : > { %1222 = vmatpush1.bf16.msra.mxu1 %v1099_v33  ;;  %1253 = vmatprep.mubr.bf16.mxu1 %v2030_v3 }
 0x1f1   : > { %1223 = vmatprep.subr.bf16.mxu1 %v1104_v32 }
 0x1f4   : > { %1224 = vmatpush1.bf16.msra.mxu1 %v1103_v8 }
 0x1f5   : > { %1817 = vmatprep.subr.bf16.mxu1 %v1972_v53 }
 0x2c2   : > { %v1795_v37 = vpop.f32.mrb[12].mxu1 }
 0x2c3   : > { %v1161_v47 = vpop.f32.mrb[13].mxu1  ;;  %v1183_v48 = vsel %vm1176_vm1, %v1795_v37, -inf }
 0x2c4   : > { %1184 = vmax.xlane.f32.xlu1 %v1183_v48  ;;  %v1796_v51 = vpop.f32.mrb[14].mxu1  ;;  %v1177_v52 = vsel %vm1176_vm1, %v1161_v47, -inf }
 0x2c5   : > { %1178 = vmax.xlane.f32.xlu0 %v1177_v52  ;;  %v1164_v11 = vpop.f32.mrb[15].mxu1  ;;  %v1186_v12 = vsel %vm1176_vm1, %v1796_v51, -inf }
 0x2c6   : > { %v1180_v13 = vsel %vm1176_vm1, %v1164_v11, -inf }
 0x2c8   : > { %1187 = vmax.xlane.f32.xlu1 %v1186_v12 }
 0x2c9   : > { %1181 = vmax.xlane.f32.xlu0 %v1180_v13 }
 0x351   : > { %v1185_v14 = vpop.xlane.xlu1 %1184 }
 0x352   : > { %v1191_v15 = vsub.f32 %v1795_v37, %v1185_v14  ;;  %v1179_v18 = vpop.xlane.xlu0 %1178 }
 0x353   : > { %v1189_v19 = vsub.f32 %v1161_v47, %v1179_v18 }
 0x354   : > { %v1197_v20 = vmul.f32 1.442695, %v1191_v15 }
 0x355   : > { %v1193_v22 = vmul.f32 1.442695, %v1189_v19  ;;  %v1188_v25 = vpop.xlane.xlu1 %1187 }
 0x356   : > { %v1192_v28 = vsub.f32 %v1796_v51, %v1188_v25  ;;  %v1182_v33 = vpop.xlane.xlu0 %1181 }
 0x357   : > { %1988 = vpow2.f32 %v1193_v22  ;;  %v1190_v34 = vsub.f32 %v1164_v11, %v1182_v33 }
 0x358   : > { %v1199_v35 = vmul.f32 1.442695, %v1192_v28  ;;  %1990 = vpow2.f32 %v1197_v20 }
 0x359   : > { %v1195_v38 = vmul.f32 1.442695, %v1190_v34 }
 0x35a   : > { %1992 = vpow2.f32 %v1199_v35 }
 0x35b   : > { %1994 = vpow2.f32 %v1195_v38 }
 0x361   : > { %v1989_v39 = vpop.eup %1988 }
 0x362   : > { %v1201_v40 = vsel %vm1176_vm1, %v1989_v39, 0.0  ;;  %v1991_v41 = vpop.eup %1990 }
 0x363   : > { %1202 = vadd.xlane.f32.xlu0 %v1201_v40  ;;  %v1207_v45 = vsel %vm1176_vm1, %v1991_v41, 0.0 }
 0x364   : > { %v1993_v42 = vpop.eup %1992 }
 0x365   : > { %v1995_v43 = vpop.eup %1994  ;;  %v1214_v44 = vpack.c.bf16 %v1993_v42, %v1991_v41  ;;  %v1210_v50 = vsel %vm1176_vm1, %v1993_v42, 0.0 }
 0x366   : > { %v1204_v46 = vsel %vm1176_vm1, %v1995_v43, 0.0  ;;  %v1213_v49 = vpack.c.bf16 %v1995_v43, %v1989_v39 }
 0x367   : > { %1208 = vadd.xlane.f32.xlu0 %v1207_v45  ;;  %1205 = vadd.xlane.f32.xlu1 %v1204_v46 }
 0x368   : > { %1714 = vmatmul.mubr.msk.bf16.vlgmr.msra.gmra.mrb[16].mxu1 %vm1176_vm1, %v1213_v49 }
 0x369   : > { %1263 = vmatprep.mubr.bf16.mxu1 %v2030_v3  ;;  %v1975_v3 = vld [vmem:[%s2488_s6 + $0x48] sm:$0xff]   ;;  %1818 = vmatpush3.bf16.msra.mxu1 %v1972_v53 }
 0x36a   : > { %1819 = vmatprep.subr.bf16.mxu1 %v1974_v55  ;;  %1799 = vmatprep.subr.bf16.mxu0 %v1975_v3 }
 0x36b   : > { %1211 = vadd.xlane.f32.xlu1 %v1210_v50  ;;  %1800 = vmatpush3.bf16.msra.mxu0 %v1975_v3 }
 0x36c   : > { %1801 = vmatprep.subr.bf16.mxu0 %v1977_v57 }
 0x36d   : > { %1820 = vmatpush3.bf16.msra.mxu1 %v1974_v55 }
 0x36e   : > { %1821 = vmatprep.subr.bf16.mxu1 %v1976_v56 }
 0x36f   : > { %1802 = vmatpush3.bf16.msra.mxu0 %v1977_v57 }
 0x370   : > { %1715 = vmatmul.mubr.msk.bf16.gmra.mrb[20].mxu1 %vm1176_vm1, %v1214_v44  ;;  %1803 = vmatprep.subr.bf16.mxu0 %v1979_v59  ;;  %v1732_v44 = vld [vmem:[%s2489_s7] ss:$0 sm:$0xff] }
 0x371   : > { %1822 = vmatpush3.bf16.msra.mxu1 %v1976_v56 }
 0x372   : > { %1823 = vmatprep.subr.bf16.mxu1 %v1978_v58 }
 0x373   : > { %1804 = vmatpush3.bf16.msra.mxu0 %v1979_v59 }
 0x374   : > { %1805 = vmatprep.subr.bf16.mxu0 %v1981_v61 }
 0x375   : > { %1824 = vmatpush3.bf16.msra.mxu1 %v1978_v58 }
 0x376   : > { %1825 = vmatprep.subr.bf16.mxu1 %v1980_v60 }
 0x377   : > { %1806 = vmatpush3.bf16.msra.mxu0 %v1981_v61 }
 0x378   : > { %1807 = vmatprep.subr.bf16.mxu0 %v1983_v63 }
 0x379   : > { %1826 = vmatpush3.bf16.msra.mxu1 %v1980_v60 }
 0x37a   : > { %1827 = vmatprep.subr.bf16.mxu1 %v1982_v62 }
 0x37b   : > { %1808 = vmatpush3.bf16.msra.mxu0 %v1983_v63 }
 0x37c   : > { %1809 = vmatprep.subr.bf16.mxu0 %v1985_v1 }
 0x37d   : > { %1828 = vmatpush3.bf16.msra.mxu1 %v1982_v62 }
 0x37e   : > { %1829 = vmatprep.subr.bf16.mxu1 %v1984_v0 }
 0x37f   : > { %1810 = vmatpush3.bf16.msra.mxu0 %v1985_v1 }
 0x380   : > { %1811 = vmatprep.subr.bf16.mxu0 %v1987_v31 }
 0x381   : > { %1830 = vmatpush3.bf16.msra.mxu1 %v1984_v0 }
 0x382   : > { %1831 = vmatprep.subr.bf16.mxu1 %v1986_v2 }
 0x383   : > { %1812 = vmatpush3.bf16.msra.mxu0 %v1987_v31 }
 0x385   : > { %1832 = vmatpush3.bf16.msra.mxu1 %v1986_v2 }
 0x3f0   : > { %v1203_v4 = vpop.xlane.xlu0 %1202 }
 0x3f1   : > { %1996 = vrcp.f32 %v1203_v4 }
 0x3f4   : > { %v1206_v36 = vpop.xlane.xlu1 %1205  ;;  %v1209_v5 = vpop.xlane.xlu0 %1208 }
 0x3f5   : > { %1998 = vrcp.f32 %v1206_v36 }
 0x3f6   : > { %2000 = vrcp.f32 %v1209_v5 }
 0x3f8   : > { %v1212_v6 = vpop.xlane.xlu1 %1211 }
 0x3f9   : > { %2002 = vrcp.f32 %v1212_v6 }
 0x3fb   : > { %v1997_v7 = vpop.eup %1996 }
 0x3ff   : > { %v1999_v32 = vpop.eup %1998 }
 0x400   : > { %v2001_v18 = vpop.eup %2000 }
 0x403   : > { %v2003_v28 = vpop.eup %2002 }
 0x43b   : > { %v1255_v8 = vpop.f32.mrb[16].mxu1 }
 0x43c   : > { %v1278_v9 = vmul.f32 %v1997_v7, %v1255_v8  ;;  %v1257_v10 = vpop.f32.mrb[17].mxu1 }
 0x43d   : > { %v1279_v37 = vmul.f32 %v1997_v7, %v1257_v10  ;;  %v1259_v47 = vpop.f32.mrb[18].mxu1 }
 0x43e   : > { %v1280_v48 = vmul.f32 %v1999_v32, %v1259_v47  ;;  %v1261_v51 = vpop.f32.mrb[19].mxu1  ;;  %v1292_v11 = vadd.f32 %v1278_v9, %v2162_v21 }
 0x43f   : > { %v1281_v52 = vmul.f32 %v1999_v32, %v1261_v51  ;;  %v1298_v13 = vadd.f32 %v1279_v37, %v719_v23 }
 0x440   : > { %v1293_v12 = vadd.f32 %v1280_v48, %v2162_v21 }
 0x441   : > { %v1299_v14 = vadd.f32 %v1281_v52, %v720_v24 }
 0x442   : > { %v1296_v15 = vpack.c.bf16 %v1293_v12, %v1292_v11 }
 0x443   : > { %v1265_v19 = vpop.f32.mrb[20].mxu1  ;;  %v1302_v20 = vpack.c.bf16 %v1299_v14, %v1298_v13 }
 0x444   : > { %v1282_v22 = vmul.f32 %v2001_v18, %v1265_v19  ;;  %v1267_v25 = vpop.f32.mrb[21].mxu1  ;;  %1833 = vmatprep.mubr.bf16.mxu1 %v1296_v15 }
 0x445   : > { %v1283_v33 = vmul.f32 %v2001_v18, %v1267_v25  ;;  %v1269_v34 = vpop.f32.mrb[22].mxu1  ;;  %1813 = vmatprep.mubr.bf16.mxu0 %v1302_v20 }
 0x446   : > { %v1284_v35 = vmul.f32 %v2003_v28, %v1269_v34  ;;  %v1271_v38 = vpop.f32.mrb[23].mxu1  ;;  %v1294_v16 = vadd.f32 %v1282_v22, %v2162_v21 }
 0x447   : > { %v1285_v39 = vmul.f32 %v2003_v28, %v1271_v38  ;;  %v1300_v23 = vadd.f32 %v1283_v33, %v721_v29 }
 0x448   : > { %v1295_v17 = vadd.f32 %v1284_v35, %v2162_v21 }
 0x449   : > { %v1301_v24 = vadd.f32 %v1285_v39, %v722_v30 }
 0x44a   : > { %v1297_v40 = vpack.c.bf16 %v1295_v17, %v1294_v16 }
 0x44b   : > { %v1303_v41 = vpack.c.bf16 %v1301_v24, %v1300_v23 }
 0x44c   : > { %1834 = vmatmul.mubr.bf16.vlgmr.msra.gmra.mrb[24].mxu1 %v1297_v40 }
 0x44d   : > { %1814 = vmatmul.mubr.bf16.vlgmr.msra.gmra.mrb[16].mxu0 %v1303_v41 }
 0x51f   : > { %v1835_v42 = vpop.f32.mrb[24].mxu1 }
 0x520   : > { %v1815_v43 = vpop.f32.mrb[16].mxu0  ;;  %v1515_v45 = vpop.f32.mrb[25].mxu1 }
 0x521   : > { %v1524_v46 = vadd.f32 %v1835_v42, %v1815_v43  ;;  %v1418_v21 = vpop.f32.mrb[17].mxu0  ;;  %v1836_v49 = vpop.f32.mrb[26].mxu1 }
 0x522   : > { %v1516_v26 = vadd.f32 %v1515_v45, %v1418_v21  ;;  %v1816_v29 = vpop.f32.mrb[18].mxu0  ;;  %v1518_v50 = vpop.f32.mrb[27].mxu1 }
 0x523   : > { %v1539_v27 = vadd.f32 %v1732_v44, %v1524_v46  ;;  %v1527_v30 = vadd.f32 %v1836_v49, %v1816_v29  ;;  %v1421_v53 = vpop.f32.mrb[19].mxu0 }
 0x524   : > { %v1537_v54 = vadd.f32 %v1732_v44, %v1516_v26  ;;  %v1519_v55 = vadd.f32 %v1518_v50, %v1421_v53 }
 0x525   : > { %v1543_v3 = vmax.f32 %v1539_v27, 0.0  ;;  %v1540_v56 = vadd.f32 %v1732_v44, %v1527_v30 }
 0x526   : > { %v1541_v57 = vmax.f32 %v1537_v54, 0.0  ;;  %v1538_v58 = vadd.f32 %v1732_v44, %v1519_v55 }
 0x527   : > { %1547 = vst [vmem:[%s324_s24 + $0x10] sm:$0xff] %v1543_v3  ;;  %v1544_v59 = vmax.f32 %v1540_v56, 0.0 }
 0x528   : > { %1545 = vst [vmem:[%s324_s24] sm:$0xff] %v1541_v57  ;;  %v1542_v60 = vmax.f32 %v1538_v58, 0.0 }
 0x529   : > { %1548 = vst [vmem:[%s324_s24 + $0x18] sm:$0xff] %v1544_v59 }
 0x52a   : > { %1546 = vst [vmem:[%s324_s24 + $0x8] sm:$0xff] %v1542_v60 }
 0x52b PF: > { %s18_s29 = sadd.s32 1, %s2026_s29   ;;  %s2491_s27 = smov %s2022_s28 }
 0x52c   : > { %p15_p5 = scmp.ge.s32.totalorder %s18_s29, 4   ;;  %s2492_s28 = smov %s2494_s30 }
 0x52e   :  { %17 = sbr.rel (!%p15_p5) target bundleno = 2 (0x2), region = 88 }

</bundles_post_ra>
